<compile_context>
chip_gen: v5e
topology: v5e:2x2
jax: 0.10.0
libtpu: 0.0.40
codegen_flags: <defaults>
</compile_context>

<pallas_src>
import jax
import jax.numpy as jnp
from jax.experimental import pallas as pl
from jax.experimental.pallas import tpu as pltpu


# ------------------------------ fused kernel ------------------------------- #

def generator_fused_kernel(
    z_ref, w1_ref, b1_ref, g1_ref, be1_ref,
    w1e_ref, w1o_ref, bc1_ref, g2_ref, be2_ref,
    w2e_ref, w2o_ref, bc2_ref, g3_ref, be3_ref,
    w3_ref, bc3_ref,
    o_ref,
):
    f32 = jnp.float32
    B = z_ref.shape[0]
    C1 = w1e_ref.shape[1]            # 128
    C2 = w2e_ref.shape[1]            # 64
    L0 = w1_ref.shape[1] // C1       # init_size (multiple of 8 for layout no-ops)
    M0 = B * L0

    def shift_prev(x):
        # r[:, l] = x[:, l-1]; r[:, 0] = 0  (left conv zero-pad, post-activation)
        return jnp.concatenate(
            [jnp.zeros((B, 1, x.shape[-1]), f32), x[:, :L0 - 1, :]], axis=1)

    def shift_next(x):
        # r[:, l] = x[:, l+1]; r[:, L0-1] = 0  (right conv zero-pad)
        return jnp.concatenate(
            [x[:, 1:, :], jnp.zeros((B, 1, x.shape[-1]), f32)], axis=1)

    def lane_cat2(a, b):
        # (B, L0, C) x 2 -> (B*L0, 2C): lane concat + leading-dim merge (no-op)
        return jnp.concatenate([a, b], axis=-1).reshape(M0, 2 * a.shape[-1])

    def lrelu(x):
        return jnp.where(x >= 0.0, x, 0.2 * x)

    # ---------------- stage 0: Linear + BatchNorm1d(128, eps=1e-5) ------------
    lin = jnp.dot(z_ref[...], w1_ref[...], preferred_element_type=f32) + b1_ref[...]
    # (B, L0*C1) -> (B, L0, C1): columns are pre-permuted position-major, so this
    # is L0 aligned 128-lane slices packed once along the sublane axis.
    x0 = jnp.concatenate(
        [lin[:, l * C1:(l + 1) * C1][:, None, :] for l in range(L0)], axis=1)
    x02 = x0.reshape(M0, C1)

    inv_n0 = 1.0 / (B * L0)
    s0 = jnp.sum(x02, axis=0, keepdims=True)
    q0 = jnp.sum(x02 * x02, axis=0, keepdims=True)
    m0 = s0 * inv_n0
    v0 = jnp.maximum(q0 * inv_n0 - m0 * m0, 0.0)            # biased variance
    sc0 = jax.lax.rsqrt(v0 + 1e-5) * g1_ref[...]
    sh0 = be1_ref[...] - m0 * sc0
    x0 = (x02 * sc0 + sh0).reshape(B, L0, C1)

    # ------ stage 1: [Upsample(2)+Conv1d(128,128,3,p=1)] folded + BN + LReLU ---
    # even stream E = conv output positions 2l, odd stream O = positions 2l+1.
    ye1 = jnp.dot(lane_cat2(shift_prev(x0), x0), w1e_ref[...],
                  preferred_element_type=f32) + bc1_ref[...]        # (M0, C1)
    yo1 = jnp.dot(lane_cat2(x0, shift_next(x0)), w1o_ref[...],
                  preferred_element_type=f32) + bc1_ref[...]

    inv_n1 = 1.0 / (2 * M0)
    s1 = jnp.sum(ye1, axis=0, keepdims=True) + jnp.sum(yo1, axis=0, keepdims=True)
    q1 = (jnp.sum(ye1 * ye1, axis=0, keepdims=True)
          + jnp.sum(yo1 * yo1, axis=0, keepdims=True))
    m1 = s1 * inv_n1
    v1 = jnp.maximum(q1 * inv_n1 - m1 * m1, 0.0)
    sc1 = jax.lax.rsqrt(v1 + 0.8) * g2_ref[...]
    sh1 = be2_ref[...] - m1 * sc1
    E = lrelu(ye1 * sc1 + sh1).reshape(B, L0, C1)    # stage-1 positions 2l
    O = lrelu(yo1 * sc1 + sh1).reshape(B, L0, C1)    # stage-1 positions 2l+1

    # ------ stage 2: [Upsample(2)+Conv1d(128,64,3,p=1)] folded + BN + LReLU ----
    # Four parity streams of the length-L2 output (positions 4l+r), stacked
    # along M so each weight needs only one M=2*B*L0 matmul.
    eo = lane_cat2(E, O)
    in_e2 = jnp.concatenate([lane_cat2(shift_prev(O), E), eo], axis=0)
    in_o2 = jnp.concatenate([eo, lane_cat2(O, shift_next(E))], axis=0)
    ye2 = jnp.dot(in_e2, w2e_ref[...], preferred_element_type=f32) + bc2_ref[...]
    yo2 = jnp.dot(in_o2, w2o_ref[...], preferred_element_type=f32) + bc2_ref[...]

    inv_n2 = 1.0 / (4 * M0)
    s2 = jnp.sum(ye2, axis=0, keepdims=True) + jnp.sum(yo2, axis=0, keepdims=True)
    q2 = (jnp.sum(ye2 * ye2, axis=0, keepdims=True)
          + jnp.sum(yo2 * yo2, axis=0, keepdims=True))
    m2 = s2 * inv_n2
    v2 = jnp.maximum(q2 * inv_n2 - m2 * m2, 0.0)
    sc2 = jax.lax.rsqrt(v2 + 0.8) * g3_ref[...]
    sh2 = be3_ref[...] - m2 * sc2
    ye2 = lrelu(ye2 * sc2 + sh2)
    yo2 = lrelu(yo2 * sc2 + sh2)
    A  = ye2[:M0, :].reshape(B, L0, C2)     # output positions 4l
    Cs = ye2[M0:, :].reshape(B, L0, C2)     # output positions 4l + 2
    Bs = yo2[:M0, :].reshape(B, L0, C2)     # output positions 4l + 1
    Ds = yo2[M0:, :].reshape(B, L0, C2)     # output positions 4l + 3

    # ---------------- stage 3: Conv1d(64,1,3,p=1) + Tanh -----------------------
    w3 = w3_ref[...]                  # (1, 1, 3*C2) = [tap0 | tap1 | tap2]
    b3 = bc3_ref[...]                 # (1, 1, 1)
    triples = (
        (shift_prev(Ds), A, Bs),      # r=0: x[j-1], x[j], x[j+1] for j = 4l
        (A, Bs, Cs),                  # r=1
        (Bs, Cs, Ds),                 # r=2
        (Cs, Ds, shift_next(A)),      # r=3
    )
    for r, (prv, ctr, nxt) in enumerate(triples):
        in3 = jnp.concatenate([prv, ctr, nxt], axis=-1)            # (B, L0, 3*C2)
        acc = jnp.sum(in3 * w3, axis=-1, keepdims=True) + b3       # (B, L0, 1)
        o_ref[:, :, r:r + 1] = jnp.tanh(acc)


# ------------------------------ forward wrapper ----------------------------- #

@jax.jit
def generator_forward(z, params):
    B = z.shape[0]
    C1 = params["w1e"].shape[1]
    L0 = params["w1"].shape[1] // C1
    L2 = 4 * L0

    vmem = pl.BlockSpec(memory_space=pltpu.MemorySpace.VMEM)
    out = pl.pallas_call(
        generator_fused_kernel,
        out_shape=jax.ShapeDtypeStruct((B, L0, 4), jnp.float32),
        in_specs=[vmem] * 17,
        out_specs=vmem,
    )(
        z, params["w1"], params["b1"], params["g1"], params["be1"],
        params["w1e"], params["w1o"], params["bc1"], params["g2"], params["be2"],
        params["w2e"], params["w2o"], params["bc2"], params["g3"], params["be3"],
        params["w3"], params["bc3"],
    )
    # (B, L0, 4) row-major == (B, 1, 4*L0) row-major: pure-metadata reshape.
    return out.reshape(B, 1, L2)


# ------------------------------ parameter setup ----------------------------- #

def init_torch_style_params(key, input_dim, init_size):
    """Random parameters in the PyTorch layouts (Linear [out,in]; Conv1d [Cout,Cin,k])."""
    ks = jax.random.split(key, 8)
    M = 128 * init_size
    f32 = jnp.float32
    return {
        "l1_w": 0.05 * jax.random.normal(ks[0], (M, input_dim), f32),
        "l1_b": 0.05 * jax.random.normal(ks[1], (M,), f32),
        "bn1_g": jnp.ones((128,), f32), "bn1_b": jnp.zeros((128,), f32),
        "c1_w": 0.05 * jax.random.normal(ks[2], (128, 128, 3), f32),
        "c1_b": 0.05 * jax.random.normal(ks[3], (128,), f32),
        "bn2_g": jnp.ones((128,), f32), "bn2_b": jnp.zeros((128,), f32),
        "c2_w": 0.05 * jax.random.normal(ks[4], (64, 128, 3), f32),
        "c2_b": 0.05 * jax.random.normal(ks[5], (64,), f32),
        "bn3_g": jnp.ones((64,), f32), "bn3_b": jnp.zeros((64,), f32),
        "c3_w": 0.05 * jax.random.normal(ks[6], (1, 64, 3), f32),
        "c3_b": 0.05 * jax.random.normal(ks[7], (1,), f32),
    }


def _fold_conv_weights(c_w):
    """Torch Conv1d weight (Cout, Cin, 3) -> even/odd matmul weights (2*Cin, Cout)
    with the nearest-2x upsample folded in:
      even (out pos 2l)  : [W0 ; W1+W2]     odd (out pos 2l+1): [W0+W1 ; W2]"""
    w0 = jnp.transpose(c_w[:, :, 0])
    w1 = jnp.transpose(c_w[:, :, 1])
    w2 = jnp.transpose(c_w[:, :, 2])
    w_even = jnp.concatenate([w0, w1 + w2], axis=0)
    w_odd = jnp.concatenate([w0 + w1, w2], axis=0)
    return w_even, w_odd


def prepare_params(tp, init_size):
    """One-time (outside the kernel) permutation / folding of torch-layout weights
    into the kernel's lane-friendly layouts.  Pure layout plumbing."""
    M, D = tp["l1_w"].shape
    C1 = tp["c1_w"].shape[0]          # 128
    C2 = tp["c2_w"].shape[0]          # 64
    # Linear: [M, D] -> [D, M], columns reordered from (c*init_size + l) to
    # (l*128 + c) so the matmul output is position-major / channel-minor.
    w1 = tp["l1_w"].T.reshape(D, C1, init_size).transpose(0, 2, 1).reshape(D, M)
    b1 = tp["l1_b"].reshape(C1, init_size).T.reshape(1, M)
    w1e, w1o = _fold_conv_weights(tp["c1_w"])
    w2e, w2o = _fold_conv_weights(tp["c2_w"])
    w3 = jnp.concatenate([tp["c3_w"][0, :, k] for k in range(3)],
                         axis=0).reshape(1, 1, 3 * C2)
    return {
        "w1": w1, "b1": b1,
        "g1": tp["bn1_g"].reshape(1, C1), "be1": tp["bn1_b"].reshape(1, C1),
        "w1e": w1e, "w1o": w1o, "bc1": tp["c1_b"].reshape(1, C1),
        "g2": tp["bn2_g"].reshape(1, C1), "be2": tp["bn2_b"].reshape(1, C1),
        "w2e": w2e, "w2o": w2o, "bc2": tp["c2_b"].reshape(1, C2),
        "g3": tp["bn3_g"].reshape(1, C2), "be3": tp["bn3_b"].reshape(1, C2),
        "w3": w3, "bc3": tp["c3_b"].reshape(1, 1, 1),
    }


# ----------------------- pure-JAX reference (for checking) ------------------ #

def reference_forward(z, tp, init_size):
    """Straightforward NCL re-implementation of the torch module (train-mode BN)."""
    B = z.shape[0]
    x = z @ tp["l1_w"].T + tp["l1_b"]                       # [B, 128*init_size]
    x = x.reshape(B, 128, init_size)                        # [B, C, L]

    def bn(x, g, b, eps):
        m = jnp.mean(x, axis=(0, 2), keepdims=True)
        v = jnp.mean((x - m) ** 2, axis=(0, 2), keepdims=True)
        return (x - m) * jax.lax.rsqrt(v + eps) * g[None, :, None] + b[None, :, None]

    def conv1d(x, w, b):                                    # w: [Cout, Cin, 3]
        L = x.shape[2]
        xp = jnp.pad(x, ((0, 0), (0, 0), (1, 1)))
        out = sum(jnp.einsum("bcl,dc->bdl", xp[:, :, k:k + L], w[:, :, k])
                  for k in range(3))
        return out + b[None, :, None]

    def up2(x):
        return jnp.repeat(x, 2, axis=2)

    def lrelu(x):
        return jnp.where(x >= 0, x, 0.2 * x)

    x = bn(x, tp["bn1_g"], tp["bn1_b"], 1e-5)
    x = up2(x)
    x = conv1d(x, tp["c1_w"], tp["c1_b"])
    x = lrelu(bn(x, tp["bn2_g"], tp["bn2_b"], 0.8))
    x = up2(x)
    x = conv1d(x, tp["c2_w"], tp["c2_b"])
    x = lrelu(bn(x, tp["bn3_g"], tp["bn3_b"], 0.8))
    x = conv1d(x, tp["c3_w"], tp["c3_b"])
    return jnp.tanh(x)


# ----------------------------------- main ----------------------------------- #

if __name__ == "__main__":
    # Small, module-consistent shapes: batch=2, input_dim=32, output_length=64
    B = 2
    input_dim = 32
    output_channels = 1
    output_length = 64
    init_size = output_length // 4   # 16

    key = jax.random.PRNGKey(0)
    kz, kp = jax.random.split(key)
    z = jax.random.normal(kz, (B, input_dim), dtype=jnp.float32)

    torch_params = init_torch_style_params(kp, input_dim, init_size)
    params = prepare_params(torch_params, init_size)

    audio = generator_forward(z, params)
    audio = jax.block_until_ready(audio)

    assert audio.shape == (B, output_channels, output_length), audio.shape
    assert bool(jnp.all(jnp.isfinite(audio)))
    assert bool(jnp.all(jnp.abs(audio) <= 1.0))   # tanh output range

    # numerical check against the pure-JAX reference (tolerance covers MXU
    # default-precision differences between the two paths)
    ref = reference_forward(z, torch_params, init_size)
    max_err = float(jnp.max(jnp.abs(audio - ref)))
    assert max_err < 5e-2, f"max abs error vs reference: {max_err}"

    print("KERNEL_OK")
</pallas_src>

<mosaic_0001>
module attributes {stable_mosaic.version = 11 : i64} {
  func.func @generator_fused_kernel(%arg0: memref<2x32xf32, #tpu.memory_space<vmem>>, %arg1: memref<32x2048xf32, #tpu.memory_space<vmem>>, %arg2: memref<1x2048xf32, #tpu.memory_space<vmem>>, %arg3: memref<1x128xf32, #tpu.memory_space<vmem>>, %arg4: memref<1x128xf32, #tpu.memory_space<vmem>>, %arg5: memref<256x128xf32, #tpu.memory_space<vmem>>, %arg6: memref<256x128xf32, #tpu.memory_space<vmem>>, %arg7: memref<1x128xf32, #tpu.memory_space<vmem>>, %arg8: memref<1x128xf32, #tpu.memory_space<vmem>>, %arg9: memref<1x128xf32, #tpu.memory_space<vmem>>, %arg10: memref<256x64xf32, #tpu.memory_space<vmem>>, %arg11: memref<256x64xf32, #tpu.memory_space<vmem>>, %arg12: memref<1x64xf32, #tpu.memory_space<vmem>>, %arg13: memref<1x64xf32, #tpu.memory_space<vmem>>, %arg14: memref<1x64xf32, #tpu.memory_space<vmem>>, %arg15: memref<1x1x192xf32, #tpu.memory_space<vmem>>, %arg16: memref<1x1x1xf32, #tpu.memory_space<vmem>>, %arg17: memref<2x16x4xf32, #tpu.memory_space<vmem>>) attributes {dimension_semantics = [], scalar_prefetch = 0 : i64, scratch_operands = 0 : i64, tpu.core_type = #tpu.core_type<tc>} {
    %c0 = arith.constant 0 : index
    %c0_0 = arith.constant 0 : index
    %0 = vector.load %arg0[%c0, %c0_0] : memref<2x32xf32, #tpu.memory_space<vmem>>, vector<2x32xf32>
    %c0_1 = arith.constant 0 : index
    %c0_2 = arith.constant 0 : index
    %1 = vector.load %arg1[%c0_1, %c0_2] : memref<32x2048xf32, #tpu.memory_space<vmem>>, vector<32x2048xf32>
    %cst = arith.constant dense<0.000000e+00> : vector<2x2048xf32>
    %2 = tpu.matmul %0, %1, %cst {dimension_numbers = #tpu.dot_dimension_numbers<[1], [0], [0], [1], [0, 0, 1, 1], [], []>} : vector<2x32xf32>, vector<32x2048xf32>, vector<2x2048xf32> -> vector<2x2048xf32>
    %c0_3 = arith.constant 0 : index
    %c0_4 = arith.constant 0 : index
    %3 = vector.load %arg2[%c0_3, %c0_4] : memref<1x2048xf32, #tpu.memory_space<vmem>>, vector<1x2048xf32>
    %4 = vector.broadcast %3 : vector<1x2048xf32> to vector<2x2048xf32>
    %5 = arith.addf %2, %4 : vector<2x2048xf32>
    %6 = vector.extract_strided_slice %5 {offsets = [0, 0], sizes = [2, 128], strides = [1, 1]} : vector<2x2048xf32> to vector<2x128xf32>
    %7 = vector.shape_cast %6 : vector<2x128xf32> to vector<2x1x128xf32>
    %8 = vector.extract_strided_slice %5 {offsets = [0, 128], sizes = [2, 128], strides = [1, 1]} : vector<2x2048xf32> to vector<2x128xf32>
    %9 = vector.shape_cast %8 : vector<2x128xf32> to vector<2x1x128xf32>
    %10 = vector.extract_strided_slice %5 {offsets = [0, 256], sizes = [2, 128], strides = [1, 1]} : vector<2x2048xf32> to vector<2x128xf32>
    %11 = vector.shape_cast %10 : vector<2x128xf32> to vector<2x1x128xf32>
    %12 = vector.extract_strided_slice %5 {offsets = [0, 384], sizes = [2, 128], strides = [1, 1]} : vector<2x2048xf32> to vector<2x128xf32>
    %13 = vector.shape_cast %12 : vector<2x128xf32> to vector<2x1x128xf32>
    %14 = vector.extract_strided_slice %5 {offsets = [0, 512], sizes = [2, 128], strides = [1, 1]} : vector<2x2048xf32> to vector<2x128xf32>
    %15 = vector.shape_cast %14 : vector<2x128xf32> to vector<2x1x128xf32>
    %16 = vector.extract_strided_slice %5 {offsets = [0, 640], sizes = [2, 128], strides = [1, 1]} : vector<2x2048xf32> to vector<2x128xf32>
    %17 = vector.shape_cast %16 : vector<2x128xf32> to vector<2x1x128xf32>
    %18 = vector.extract_strided_slice %5 {offsets = [0, 768], sizes = [2, 128], strides = [1, 1]} : vector<2x2048xf32> to vector<2x128xf32>
    %19 = vector.shape_cast %18 : vector<2x128xf32> to vector<2x1x128xf32>
    %20 = vector.extract_strided_slice %5 {offsets = [0, 896], sizes = [2, 128], strides = [1, 1]} : vector<2x2048xf32> to vector<2x128xf32>
    %21 = vector.shape_cast %20 : vector<2x128xf32> to vector<2x1x128xf32>
    %22 = vector.extract_strided_slice %5 {offsets = [0, 1024], sizes = [2, 128], strides = [1, 1]} : vector<2x2048xf32> to vector<2x128xf32>
    %23 = vector.shape_cast %22 : vector<2x128xf32> to vector<2x1x128xf32>
    %24 = vector.extract_strided_slice %5 {offsets = [0, 1152], sizes = [2, 128], strides = [1, 1]} : vector<2x2048xf32> to vector<2x128xf32>
    %25 = vector.shape_cast %24 : vector<2x128xf32> to vector<2x1x128xf32>
    %26 = vector.extract_strided_slice %5 {offsets = [0, 1280], sizes = [2, 128], strides = [1, 1]} : vector<2x2048xf32> to vector<2x128xf32>
    %27 = vector.shape_cast %26 : vector<2x128xf32> to vector<2x1x128xf32>
    %28 = vector.extract_strided_slice %5 {offsets = [0, 1408], sizes = [2, 128], strides = [1, 1]} : vector<2x2048xf32> to vector<2x128xf32>
    %29 = vector.shape_cast %28 : vector<2x128xf32> to vector<2x1x128xf32>
    %30 = vector.extract_strided_slice %5 {offsets = [0, 1536], sizes = [2, 128], strides = [1, 1]} : vector<2x2048xf32> to vector<2x128xf32>
    %31 = vector.shape_cast %30 : vector<2x128xf32> to vector<2x1x128xf32>
    %32 = vector.extract_strided_slice %5 {offsets = [0, 1664], sizes = [2, 128], strides = [1, 1]} : vector<2x2048xf32> to vector<2x128xf32>
    %33 = vector.shape_cast %32 : vector<2x128xf32> to vector<2x1x128xf32>
    %34 = vector.extract_strided_slice %5 {offsets = [0, 1792], sizes = [2, 128], strides = [1, 1]} : vector<2x2048xf32> to vector<2x128xf32>
    %35 = vector.shape_cast %34 : vector<2x128xf32> to vector<2x1x128xf32>
    %36 = vector.extract_strided_slice %5 {offsets = [0, 1920], sizes = [2, 128], strides = [1, 1]} : vector<2x2048xf32> to vector<2x128xf32>
    %37 = vector.shape_cast %36 : vector<2x128xf32> to vector<2x1x128xf32>
    %38 = tpu.concatenate %7, %9, %11, %13, %15, %17, %19, %21, %23, %25, %27, %29, %31, %33, %35, %37 in 1 : vector<2x1x128xf32>, vector<2x1x128xf32>, vector<2x1x128xf32>, vector<2x1x128xf32>, vector<2x1x128xf32>, vector<2x1x128xf32>, vector<2x1x128xf32>, vector<2x1x128xf32>, vector<2x1x128xf32>, vector<2x1x128xf32>, vector<2x1x128xf32>, vector<2x1x128xf32>, vector<2x1x128xf32>, vector<2x1x128xf32>, vector<2x1x128xf32>, vector<2x1x128xf32> -> vector<2x16x128xf32>
    %39 = vector.shape_cast %38 : vector<2x16x128xf32> to vector<32x128xf32>
    %cst_5 = arith.constant dense<0.000000e+00> : vector<128xf32>
    %40 = vector.multi_reduction <add>, %39, %cst_5 [0] : vector<32x128xf32> to vector<128xf32>
    %41 = vector.shape_cast %40 : vector<128xf32> to vector<1x128xf32>
    %42 = arith.mulf %39, %39 : vector<32x128xf32>
    %cst_6 = arith.constant dense<0.000000e+00> : vector<128xf32>
    %43 = vector.multi_reduction <add>, %42, %cst_6 [0] : vector<32x128xf32> to vector<128xf32>
    %44 = vector.shape_cast %43 : vector<128xf32> to vector<1x128xf32>
    %cst_7 = arith.constant 3.125000e-02 : f32
    %45 = vector.broadcast %cst_7 : f32 to vector<1x128xf32>
    %46 = arith.mulf %41, %45 : vector<1x128xf32>
    %cst_8 = arith.constant 3.125000e-02 : f32
    %47 = vector.broadcast %cst_8 : f32 to vector<1x128xf32>
    %48 = arith.mulf %44, %47 : vector<1x128xf32>
    %49 = arith.mulf %46, %46 : vector<1x128xf32>
    %50 = arith.subf %48, %49 : vector<1x128xf32>
    %cst_9 = arith.constant 0.000000e+00 : f32
    %51 = vector.broadcast %cst_9 : f32 to vector<1x128xf32>
    %52 = arith.maximumf %50, %51 : vector<1x128xf32>
    %cst_10 = arith.constant 9.99999974E-6 : f32
    %53 = vector.broadcast %cst_10 : f32 to vector<1x128xf32>
    %54 = arith.addf %52, %53 : vector<1x128xf32>
    %55 = math.rsqrt %54 : vector<1x128xf32>
    %c0_11 = arith.constant 0 : index
    %c0_12 = arith.constant 0 : index
    %56 = vector.load %arg3[%c0_11, %c0_12] : memref<1x128xf32, #tpu.memory_space<vmem>>, vector<1x128xf32>
    %57 = arith.mulf %55, %56 : vector<1x128xf32>
    %c0_13 = arith.constant 0 : index
    %c0_14 = arith.constant 0 : index
    %58 = vector.load %arg4[%c0_13, %c0_14] : memref<1x128xf32, #tpu.memory_space<vmem>>, vector<1x128xf32>
    %59 = arith.mulf %46, %57 : vector<1x128xf32>
    %60 = arith.subf %58, %59 : vector<1x128xf32>
    %61 = vector.broadcast %57 : vector<1x128xf32> to vector<32x128xf32>
    %62 = arith.mulf %39, %61 : vector<32x128xf32>
    %63 = vector.broadcast %60 : vector<1x128xf32> to vector<32x128xf32>
    %64 = arith.addf %62, %63 : vector<32x128xf32>
    %65 = vector.shape_cast %64 : vector<32x128xf32> to vector<2x16x128xf32>
    %cst_15 = arith.constant 0.000000e+00 : f32
    %66 = vector.broadcast %cst_15 : f32 to vector<2x1x128xf32>
    %67 = vector.extract_strided_slice %65 {offsets = [0, 0, 0], sizes = [2, 15, 128], strides = [1, 1, 1]} : vector<2x16x128xf32> to vector<2x15x128xf32>
    %68 = tpu.concatenate %66, %67 in 1 : vector<2x1x128xf32>, vector<2x15x128xf32> -> vector<2x16x128xf32>
    %69 = tpu.concatenate %68, %65 in 2 : vector<2x16x128xf32>, vector<2x16x128xf32> -> vector<2x16x256xf32>
    %70 = vector.shape_cast %69 : vector<2x16x256xf32> to vector<32x256xf32>
    %c0_16 = arith.constant 0 : index
    %c0_17 = arith.constant 0 : index
    %71 = vector.load %arg5[%c0_16, %c0_17] : memref<256x128xf32, #tpu.memory_space<vmem>>, vector<256x128xf32>
    %cst_18 = arith.constant dense<0.000000e+00> : vector<32x128xf32>
    %72 = tpu.matmul %70, %71, %cst_18 {dimension_numbers = #tpu.dot_dimension_numbers<[1], [0], [0], [1], [0, 0, 1, 1], [], []>} : vector<32x256xf32>, vector<256x128xf32>, vector<32x128xf32> -> vector<32x128xf32>
    %c0_19 = arith.constant 0 : index
    %c0_20 = arith.constant 0 : index
    %73 = vector.load %arg7[%c0_19, %c0_20] : memref<1x128xf32, #tpu.memory_space<vmem>>, vector<1x128xf32>
    %74 = vector.broadcast %73 : vector<1x128xf32> to vector<32x128xf32>
    %75 = arith.addf %72, %74 : vector<32x128xf32>
    %76 = vector.extract_strided_slice %65 {offsets = [0, 1, 0], sizes = [2, 15, 128], strides = [1, 1, 1]} : vector<2x16x128xf32> to vector<2x15x128xf32>
    %cst_21 = arith.constant 0.000000e+00 : f32
    %77 = vector.broadcast %cst_21 : f32 to vector<2x1x128xf32>
    %78 = tpu.concatenate %76, %77 in 1 : vector<2x15x128xf32>, vector<2x1x128xf32> -> vector<2x16x128xf32>
    %79 = tpu.concatenate %65, %78 in 2 : vector<2x16x128xf32>, vector<2x16x128xf32> -> vector<2x16x256xf32>
    %80 = vector.shape_cast %79 : vector<2x16x256xf32> to vector<32x256xf32>
    %c0_22 = arith.constant 0 : index
    %c0_23 = arith.constant 0 : index
    %81 = vector.load %arg6[%c0_22, %c0_23] : memref<256x128xf32, #tpu.memory_space<vmem>>, vector<256x128xf32>
    %cst_24 = arith.constant dense<0.000000e+00> : vector<32x128xf32>
    %82 = tpu.matmul %80, %81, %cst_24 {dimension_numbers = #tpu.dot_dimension_numbers<[1], [0], [0], [1], [0, 0, 1, 1], [], []>} : vector<32x256xf32>, vector<256x128xf32>, vector<32x128xf32> -> vector<32x128xf32>
    %c0_25 = arith.constant 0 : index
    %c0_26 = arith.constant 0 : index
    %83 = vector.load %arg7[%c0_25, %c0_26] : memref<1x128xf32, #tpu.memory_space<vmem>>, vector<1x128xf32>
    %84 = vector.broadcast %83 : vector<1x128xf32> to vector<32x128xf32>
    %85 = arith.addf %82, %84 : vector<32x128xf32>
    %cst_27 = arith.constant dense<0.000000e+00> : vector<128xf32>
    %86 = vector.multi_reduction <add>, %75, %cst_27 [0] : vector<32x128xf32> to vector<128xf32>
    %87 = vector.shape_cast %86 : vector<128xf32> to vector<1x128xf32>
    %cst_28 = arith.constant dense<0.000000e+00> : vector<128xf32>
    %88 = vector.multi_reduction <add>, %85, %cst_28 [0] : vector<32x128xf32> to vector<128xf32>
    %89 = vector.shape_cast %88 : vector<128xf32> to vector<1x128xf32>
    %90 = arith.addf %87, %89 : vector<1x128xf32>
    %91 = arith.mulf %75, %75 : vector<32x128xf32>
    %cst_29 = arith.constant dense<0.000000e+00> : vector<128xf32>
    %92 = vector.multi_reduction <add>, %91, %cst_29 [0] : vector<32x128xf32> to vector<128xf32>
    %93 = vector.shape_cast %92 : vector<128xf32> to vector<1x128xf32>
    %94 = arith.mulf %85, %85 : vector<32x128xf32>
    %cst_30 = arith.constant dense<0.000000e+00> : vector<128xf32>
    %95 = vector.multi_reduction <add>, %94, %cst_30 [0] : vector<32x128xf32> to vector<128xf32>
    %96 = vector.shape_cast %95 : vector<128xf32> to vector<1x128xf32>
    %97 = arith.addf %93, %96 : vector<1x128xf32>
    %cst_31 = arith.constant 1.562500e-02 : f32
    %98 = vector.broadcast %cst_31 : f32 to vector<1x128xf32>
    %99 = arith.mulf %90, %98 : vector<1x128xf32>
    %cst_32 = arith.constant 1.562500e-02 : f32
    %100 = vector.broadcast %cst_32 : f32 to vector<1x128xf32>
    %101 = arith.mulf %97, %100 : vector<1x128xf32>
    %102 = arith.mulf %99, %99 : vector<1x128xf32>
    %103 = arith.subf %101, %102 : vector<1x128xf32>
    %cst_33 = arith.constant 0.000000e+00 : f32
    %104 = vector.broadcast %cst_33 : f32 to vector<1x128xf32>
    %105 = arith.maximumf %103, %104 : vector<1x128xf32>
    %cst_34 = arith.constant 8.000000e-01 : f32
    %106 = vector.broadcast %cst_34 : f32 to vector<1x128xf32>
    %107 = arith.addf %105, %106 : vector<1x128xf32>
    %108 = math.rsqrt %107 : vector<1x128xf32>
    %c0_35 = arith.constant 0 : index
    %c0_36 = arith.constant 0 : index
    %109 = vector.load %arg8[%c0_35, %c0_36] : memref<1x128xf32, #tpu.memory_space<vmem>>, vector<1x128xf32>
    %110 = arith.mulf %108, %109 : vector<1x128xf32>
    %c0_37 = arith.constant 0 : index
    %c0_38 = arith.constant 0 : index
    %111 = vector.load %arg9[%c0_37, %c0_38] : memref<1x128xf32, #tpu.memory_space<vmem>>, vector<1x128xf32>
    %112 = arith.mulf %99, %110 : vector<1x128xf32>
    %113 = arith.subf %111, %112 : vector<1x128xf32>
    %114 = vector.broadcast %110 : vector<1x128xf32> to vector<32x128xf32>
    %115 = arith.mulf %75, %114 : vector<32x128xf32>
    %116 = vector.broadcast %113 : vector<1x128xf32> to vector<32x128xf32>
    %117 = arith.addf %115, %116 : vector<32x128xf32>
    %cst_39 = arith.constant 0.000000e+00 : f32
    %118 = vector.broadcast %cst_39 : f32 to vector<32x128xf32>
    %119 = arith.cmpf oge, %117, %118 : vector<32x128xf32>
    %cst_40 = arith.constant 2.000000e-01 : f32
    %120 = vector.broadcast %cst_40 : f32 to vector<32x128xf32>
    %121 = arith.mulf %120, %117 : vector<32x128xf32>
    %122 = arith.select %119, %117, %121 : vector<32x128xi1>, vector<32x128xf32>
    %123 = vector.shape_cast %122 : vector<32x128xf32> to vector<2x16x128xf32>
    %124 = vector.broadcast %110 : vector<1x128xf32> to vector<32x128xf32>
    %125 = arith.mulf %85, %124 : vector<32x128xf32>
    %126 = vector.broadcast %113 : vector<1x128xf32> to vector<32x128xf32>
    %127 = arith.addf %125, %126 : vector<32x128xf32>
    %cst_41 = arith.constant 0.000000e+00 : f32
    %128 = vector.broadcast %cst_41 : f32 to vector<32x128xf32>
    %129 = arith.cmpf oge, %127, %128 : vector<32x128xf32>
    %cst_42 = arith.constant 2.000000e-01 : f32
    %130 = vector.broadcast %cst_42 : f32 to vector<32x128xf32>
    %131 = arith.mulf %130, %127 : vector<32x128xf32>
    %132 = arith.select %129, %127, %131 : vector<32x128xi1>, vector<32x128xf32>
    %133 = vector.shape_cast %132 : vector<32x128xf32> to vector<2x16x128xf32>
    %134 = tpu.concatenate %123, %133 in 2 : vector<2x16x128xf32>, vector<2x16x128xf32> -> vector<2x16x256xf32>
    %135 = vector.shape_cast %134 : vector<2x16x256xf32> to vector<32x256xf32>
    %cst_43 = arith.constant 0.000000e+00 : f32
    %136 = vector.broadcast %cst_43 : f32 to vector<2x1x128xf32>
    %137 = vector.extract_strided_slice %133 {offsets = [0, 0, 0], sizes = [2, 15, 128], strides = [1, 1, 1]} : vector<2x16x128xf32> to vector<2x15x128xf32>
    %138 = tpu.concatenate %136, %137 in 1 : vector<2x1x128xf32>, vector<2x15x128xf32> -> vector<2x16x128xf32>
    %139 = tpu.concatenate %138, %123 in 2 : vector<2x16x128xf32>, vector<2x16x128xf32> -> vector<2x16x256xf32>
    %140 = vector.shape_cast %139 : vector<2x16x256xf32> to vector<32x256xf32>
    %141 = tpu.concatenate %140, %135 in 0 : vector<32x256xf32>, vector<32x256xf32> -> vector<64x256xf32>
    %142 = vector.extract_strided_slice %123 {offsets = [0, 1, 0], sizes = [2, 15, 128], strides = [1, 1, 1]} : vector<2x16x128xf32> to vector<2x15x128xf32>
    %cst_44 = arith.constant 0.000000e+00 : f32
    %143 = vector.broadcast %cst_44 : f32 to vector<2x1x128xf32>
    %144 = tpu.concatenate %142, %143 in 1 : vector<2x15x128xf32>, vector<2x1x128xf32> -> vector<2x16x128xf32>
    %145 = tpu.concatenate %133, %144 in 2 : vector<2x16x128xf32>, vector<2x16x128xf32> -> vector<2x16x256xf32>
    %146 = vector.shape_cast %145 : vector<2x16x256xf32> to vector<32x256xf32>
    %147 = tpu.concatenate %135, %146 in 0 : vector<32x256xf32>, vector<32x256xf32> -> vector<64x256xf32>
    %c0_45 = arith.constant 0 : index
    %c0_46 = arith.constant 0 : index
    %148 = vector.load %arg10[%c0_45, %c0_46] : memref<256x64xf32, #tpu.memory_space<vmem>>, vector<256x64xf32>
    %cst_47 = arith.constant dense<0.000000e+00> : vector<64x64xf32>
    %149 = tpu.matmul %141, %148, %cst_47 {dimension_numbers = #tpu.dot_dimension_numbers<[1], [0], [0], [1], [0, 0, 1, 1], [], []>} : vector<64x256xf32>, vector<256x64xf32>, vector<64x64xf32> -> vector<64x64xf32>
    %c0_48 = arith.constant 0 : index
    %c0_49 = arith.constant 0 : index
    %150 = vector.load %arg12[%c0_48, %c0_49] : memref<1x64xf32, #tpu.memory_space<vmem>>, vector<1x64xf32>
    %151 = vector.broadcast %150 : vector<1x64xf32> to vector<64x64xf32>
    %152 = arith.addf %149, %151 : vector<64x64xf32>
    %c0_50 = arith.constant 0 : index
    %c0_51 = arith.constant 0 : index
    %153 = vector.load %arg11[%c0_50, %c0_51] : memref<256x64xf32, #tpu.memory_space<vmem>>, vector<256x64xf32>
    %cst_52 = arith.constant dense<0.000000e+00> : vector<64x64xf32>
    %154 = tpu.matmul %147, %153, %cst_52 {dimension_numbers = #tpu.dot_dimension_numbers<[1], [0], [0], [1], [0, 0, 1, 1], [], []>} : vector<64x256xf32>, vector<256x64xf32>, vector<64x64xf32> -> vector<64x64xf32>
    %c0_53 = arith.constant 0 : index
    %c0_54 = arith.constant 0 : index
    %155 = vector.load %arg12[%c0_53, %c0_54] : memref<1x64xf32, #tpu.memory_space<vmem>>, vector<1x64xf32>
    %156 = vector.broadcast %155 : vector<1x64xf32> to vector<64x64xf32>
    %157 = arith.addf %154, %156 : vector<64x64xf32>
    %cst_55 = arith.constant dense<0.000000e+00> : vector<64xf32>
    %158 = vector.multi_reduction <add>, %152, %cst_55 [0] : vector<64x64xf32> to vector<64xf32>
    %159 = vector.shape_cast %158 : vector<64xf32> to vector<1x64xf32>
    %cst_56 = arith.constant dense<0.000000e+00> : vector<64xf32>
    %160 = vector.multi_reduction <add>, %157, %cst_56 [0] : vector<64x64xf32> to vector<64xf32>
    %161 = vector.shape_cast %160 : vector<64xf32> to vector<1x64xf32>
    %162 = arith.addf %159, %161 : vector<1x64xf32>
    %163 = arith.mulf %152, %152 : vector<64x64xf32>
    %cst_57 = arith.constant dense<0.000000e+00> : vector<64xf32>
    %164 = vector.multi_reduction <add>, %163, %cst_57 [0] : vector<64x64xf32> to vector<64xf32>
    %165 = vector.shape_cast %164 : vector<64xf32> to vector<1x64xf32>
    %166 = arith.mulf %157, %157 : vector<64x64xf32>
    %cst_58 = arith.constant dense<0.000000e+00> : vector<64xf32>
    %167 = vector.multi_reduction <add>, %166, %cst_58 [0] : vector<64x64xf32> to vector<64xf32>
    %168 = vector.shape_cast %167 : vector<64xf32> to vector<1x64xf32>
    %169 = arith.addf %165, %168 : vector<1x64xf32>
    %cst_59 = arith.constant 7.812500e-03 : f32
    %170 = vector.broadcast %cst_59 : f32 to vector<1x64xf32>
    %171 = arith.mulf %162, %170 : vector<1x64xf32>
    %cst_60 = arith.constant 7.812500e-03 : f32
    %172 = vector.broadcast %cst_60 : f32 to vector<1x64xf32>
    %173 = arith.mulf %169, %172 : vector<1x64xf32>
    %174 = arith.mulf %171, %171 : vector<1x64xf32>
    %175 = arith.subf %173, %174 : vector<1x64xf32>
    %cst_61 = arith.constant 0.000000e+00 : f32
    %176 = vector.broadcast %cst_61 : f32 to vector<1x64xf32>
    %177 = arith.maximumf %175, %176 : vector<1x64xf32>
    %cst_62 = arith.constant 8.000000e-01 : f32
    %178 = vector.broadcast %cst_62 : f32 to vector<1x64xf32>
    %179 = arith.addf %177, %178 : vector<1x64xf32>
    %180 = math.rsqrt %179 : vector<1x64xf32>
    %c0_63 = arith.constant 0 : index
    %c0_64 = arith.constant 0 : index
    %181 = vector.load %arg13[%c0_63, %c0_64] : memref<1x64xf32, #tpu.memory_space<vmem>>, vector<1x64xf32>
    %182 = arith.mulf %180, %181 : vector<1x64xf32>
    %c0_65 = arith.constant 0 : index
    %c0_66 = arith.constant 0 : index
    %183 = vector.load %arg14[%c0_65, %c0_66] : memref<1x64xf32, #tpu.memory_space<vmem>>, vector<1x64xf32>
    %184 = arith.mulf %171, %182 : vector<1x64xf32>
    %185 = arith.subf %183, %184 : vector<1x64xf32>
    %186 = vector.broadcast %182 : vector<1x64xf32> to vector<64x64xf32>
    %187 = arith.mulf %152, %186 : vector<64x64xf32>
    %188 = vector.broadcast %185 : vector<1x64xf32> to vector<64x64xf32>
    %189 = arith.addf %187, %188 : vector<64x64xf32>
    %cst_67 = arith.constant 0.000000e+00 : f32
    %190 = vector.broadcast %cst_67 : f32 to vector<64x64xf32>
    %191 = arith.cmpf oge, %189, %190 : vector<64x64xf32>
    %cst_68 = arith.constant 2.000000e-01 : f32
    %192 = vector.broadcast %cst_68 : f32 to vector<64x64xf32>
    %193 = arith.mulf %192, %189 : vector<64x64xf32>
    %194 = arith.select %191, %189, %193 : vector<64x64xi1>, vector<64x64xf32>
    %195 = vector.broadcast %182 : vector<1x64xf32> to vector<64x64xf32>
    %196 = arith.mulf %157, %195 : vector<64x64xf32>
    %197 = vector.broadcast %185 : vector<1x64xf32> to vector<64x64xf32>
    %198 = arith.addf %196, %197 : vector<64x64xf32>
    %cst_69 = arith.constant 0.000000e+00 : f32
    %199 = vector.broadcast %cst_69 : f32 to vector<64x64xf32>
    %200 = arith.cmpf oge, %198, %199 : vector<64x64xf32>
    %cst_70 = arith.constant 2.000000e-01 : f32
    %201 = vector.broadcast %cst_70 : f32 to vector<64x64xf32>
    %202 = arith.mulf %201, %198 : vector<64x64xf32>
    %203 = arith.select %200, %198, %202 : vector<64x64xi1>, vector<64x64xf32>
    %204 = vector.extract_strided_slice %194 {offsets = [0, 0], sizes = [32, 64], strides = [1, 1]} : vector<64x64xf32> to vector<32x64xf32>
    %205 = vector.shape_cast %204 : vector<32x64xf32> to vector<2x16x64xf32>
    %206 = vector.extract_strided_slice %194 {offsets = [32, 0], sizes = [32, 64], strides = [1, 1]} : vector<64x64xf32> to vector<32x64xf32>
    %207 = vector.shape_cast %206 : vector<32x64xf32> to vector<2x16x64xf32>
    %208 = vector.extract_strided_slice %203 {offsets = [0, 0], sizes = [32, 64], strides = [1, 1]} : vector<64x64xf32> to vector<32x64xf32>
    %209 = vector.shape_cast %208 : vector<32x64xf32> to vector<2x16x64xf32>
    %210 = vector.extract_strided_slice %203 {offsets = [32, 0], sizes = [32, 64], strides = [1, 1]} : vector<64x64xf32> to vector<32x64xf32>
    %211 = vector.shape_cast %210 : vector<32x64xf32> to vector<2x16x64xf32>
    %c0_71 = arith.constant 0 : index
    %c0_72 = arith.constant 0 : index
    %c0_73 = arith.constant 0 : index
    %212 = vector.load %arg15[%c0_71, %c0_72, %c0_73] : memref<1x1x192xf32, #tpu.memory_space<vmem>>, vector<1x1x192xf32>
    %c0_74 = arith.constant 0 : index
    %c0_75 = arith.constant 0 : index
    %c0_76 = arith.constant 0 : index
    %213 = vector.load %arg16[%c0_74, %c0_75, %c0_76] : memref<1x1x1xf32, #tpu.memory_space<vmem>>, vector<1x1x1xf32>
    %cst_77 = arith.constant 0.000000e+00 : f32
    %214 = vector.broadcast %cst_77 : f32 to vector<2x1x64xf32>
    %215 = vector.extract_strided_slice %211 {offsets = [0, 0, 0], sizes = [2, 15, 64], strides = [1, 1, 1]} : vector<2x16x64xf32> to vector<2x15x64xf32>
    %216 = tpu.concatenate %214, %215 in 1 : vector<2x1x64xf32>, vector<2x15x64xf32> -> vector<2x16x64xf32>
    %217 = vector.extract_strided_slice %205 {offsets = [0, 1, 0], sizes = [2, 15, 64], strides = [1, 1, 1]} : vector<2x16x64xf32> to vector<2x15x64xf32>
    %cst_78 = arith.constant 0.000000e+00 : f32
    %218 = vector.broadcast %cst_78 : f32 to vector<2x1x64xf32>
    %219 = tpu.concatenate %217, %218 in 1 : vector<2x15x64xf32>, vector<2x1x64xf32> -> vector<2x16x64xf32>
    %220 = tpu.concatenate %216, %205, %209 in 2 : vector<2x16x64xf32>, vector<2x16x64xf32>, vector<2x16x64xf32> -> vector<2x16x192xf32>
    %221 = vector.broadcast %212 : vector<1x1x192xf32> to vector<2x16x192xf32>
    %222 = arith.mulf %220, %221 : vector<2x16x192xf32>
    %cst_79 = arith.constant dense<0.000000e+00> : vector<2x16xf32>
    %223 = vector.multi_reduction <add>, %222, %cst_79 [2] : vector<2x16x192xf32> to vector<2x16xf32>
    %224 = vector.shape_cast %223 : vector<2x16xf32> to vector<2x16x1xf32>
    %225 = vector.broadcast %213 : vector<1x1x1xf32> to vector<2x16x1xf32>
    %226 = arith.addf %224, %225 : vector<2x16x1xf32>
    %227 = math.tanh %226 : vector<2x16x1xf32>
    %c0_80 = arith.constant 0 : index
    %c0_81 = arith.constant 0 : index
    %c0_82 = arith.constant 0 : index
    %228 = vector.load %arg17[%c0_80, %c0_81, %c0_82] : memref<2x16x4xf32, #tpu.memory_space<vmem>>, vector<2x16x1xf32>
    tpu.vector_store %arg17[%c0_80, %c0_81, %c0_82], %227 {strides = array<i32>} : memref<2x16x4xf32, #tpu.memory_space<vmem>>, vector<2x16x1xf32>,
    %229 = tpu.concatenate %205, %209, %207 in 2 : vector<2x16x64xf32>, vector<2x16x64xf32>, vector<2x16x64xf32> -> vector<2x16x192xf32>
    %230 = vector.broadcast %212 : vector<1x1x192xf32> to vector<2x16x192xf32>
    %231 = arith.mulf %229, %230 : vector<2x16x192xf32>
    %cst_83 = arith.constant dense<0.000000e+00> : vector<2x16xf32>
    %232 = vector.multi_reduction <add>, %231, %cst_83 [2] : vector<2x16x192xf32> to vector<2x16xf32>
    %233 = vector.shape_cast %232 : vector<2x16xf32> to vector<2x16x1xf32>
    %234 = vector.broadcast %213 : vector<1x1x1xf32> to vector<2x16x1xf32>
    %235 = arith.addf %233, %234 : vector<2x16x1xf32>
    %236 = math.tanh %235 : vector<2x16x1xf32>
    %c0_84 = arith.constant 0 : index
    %c0_85 = arith.constant 0 : index
    %c1 = arith.constant 1 : index
    %237 = vector.load %arg17[%c0_84, %c0_85, %c1] : memref<2x16x4xf32, #tpu.memory_space<vmem>>, vector<2x16x1xf32>
    tpu.vector_store %arg17[%c0_84, %c0_85, %c1], %236 {strides = array<i32>} : memref<2x16x4xf32, #tpu.memory_space<vmem>>, vector<2x16x1xf32>,
    %238 = tpu.concatenate %209, %207, %211 in 2 : vector<2x16x64xf32>, vector<2x16x64xf32>, vector<2x16x64xf32> -> vector<2x16x192xf32>
    %239 = vector.broadcast %212 : vector<1x1x192xf32> to vector<2x16x192xf32>
    %240 = arith.mulf %238, %239 : vector<2x16x192xf32>
    %cst_86 = arith.constant dense<0.000000e+00> : vector<2x16xf32>
    %241 = vector.multi_reduction <add>, %240, %cst_86 [2] : vector<2x16x192xf32> to vector<2x16xf32>
    %242 = vector.shape_cast %241 : vector<2x16xf32> to vector<2x16x1xf32>
    %243 = vector.broadcast %213 : vector<1x1x1xf32> to vector<2x16x1xf32>
    %244 = arith.addf %242, %243 : vector<2x16x1xf32>
    %245 = math.tanh %244 : vector<2x16x1xf32>
    %c0_87 = arith.constant 0 : index
    %c0_88 = arith.constant 0 : index
    %c2 = arith.constant 2 : index
    %246 = vector.load %arg17[%c0_87, %c0_88, %c2] : memref<2x16x4xf32, #tpu.memory_space<vmem>>, vector<2x16x1xf32>
    tpu.vector_store %arg17[%c0_87, %c0_88, %c2], %245 {strides = array<i32>} : memref<2x16x4xf32, #tpu.memory_space<vmem>>, vector<2x16x1xf32>,
    %247 = tpu.concatenate %207, %211, %219 in 2 : vector<2x16x64xf32>, vector<2x16x64xf32>, vector<2x16x64xf32> -> vector<2x16x192xf32>
    %248 = vector.broadcast %212 : vector<1x1x192xf32> to vector<2x16x192xf32>
    %249 = arith.mulf %247, %248 : vector<2x16x192xf32>
    %cst_89 = arith.constant dense<0.000000e+00> : vector<2x16xf32>
    %250 = vector.multi_reduction <add>, %249, %cst_89 [2] : vector<2x16x192xf32> to vector<2x16xf32>
    %251 = vector.shape_cast %250 : vector<2x16xf32> to vector<2x16x1xf32>
    %252 = vector.broadcast %213 : vector<1x1x1xf32> to vector<2x16x1xf32>
    %253 = arith.addf %251, %252 : vector<2x16x1xf32>
    %254 = math.tanh %253 : vector<2x16x1xf32>
    %c0_90 = arith.constant 0 : index
    %c0_91 = arith.constant 0 : index
    %c3 = arith.constant 3 : index
    %255 = vector.load %arg17[%c0_90, %c0_91, %c3] : memref<2x16x4xf32, #tpu.memory_space<vmem>>, vector<2x16x1xf32>
    tpu.vector_store %arg17[%c0_90, %c0_91, %c3], %254 {strides = array<i32>} : memref<2x16x4xf32, #tpu.memory_space<vmem>>, vector<2x16x1xf32>,
    return
  }
}

</mosaic_0001>

<bundles_post_ra>
// kernel: generator_forward.1
= control target key start
LH: loop header
LB: loop body
LE: loop exit
PB: predicated region body
PF: predicated region fallthrough
CT: control target
= control target key end

     0   :  { %s3070_s0 = inlined_call_operand.vmem [shape: f32[2,32], index: 0, kind: input, shape index: {}]   ;;  %s3071_s1 = inlined_call_operand.vmem [shape: f32[32,2048], index: 1, kind: input, shape index: {}]   ;;  %s3072_s2 = inlined_call_operand.vmem [shape: f32[1,2048], index: 2, kind: input, shape index: {}]   ;;  %s3073_s3 = inlined_call_operand.vmem [shape: f32[1,128], index: 3, kind: input, shape index: {}]   ;;  %s3074_s4 = inlined_call_operand.vmem [shape: f32[1,128], index: 4, kind: input, shape index: {}]   ;;  %s3075_s5 = inlined_call_operand.hbm [shape: f32[256,128], index: 5, kind: input, shape index: {}]   ;;  %s3076_s6 = inlined_call_operand.hbm [shape: f32[256,128], index: 6, kind: input, shape index: {}]   ;;  %s3077_s7 = inlined_call_operand.vmem [shape: f32[1,128], index: 7, kind: input, shape index: {}]   ;;  %s3078_s8 = inlined_call_operand.vmem [shape: f32[1,128], index: 8, kind: input, shape index: {}]   ;;  %s3079_s9 = inlined_call_operand.vmem [shape: f32[1,128], index: 9, kind: input, shape index: {}]   ;;  %s3080_s10 = inlined_call_operand.vmem [shape: f32[256,64], index: 10, kind: input, shape index: {}]   ;;  %s3081_s11 = inlined_call_operand.vmem [shape: f32[256,64], index: 11, kind: input, shape index: {}]   ;;  %s3082_s12 = inlined_call_operand.vmem [shape: f32[1,64], index: 12, kind: input, shape index: {}]   ;;  %s3083_s13 = inlined_call_operand.vmem [shape: f32[1,64], index: 13, kind: input, shape index: {}]   ;;  %s3084_s14 = inlined_call_operand.vmem [shape: f32[1,64], index: 14, kind: input, shape index: {}]   ;;  %s3085_s15 = inlined_call_operand.vmem [shape: f32[1,1,192], index: 15, kind: input, shape index: {}]   ;;  %s3086_s16 = inlined_call_operand.<no memory space> [shape: f32[1,1,1], index: 16, kind: input, shape index: {}]   ;;  %s3087_s17 = inlined_call_operand.vmem [shape: f32[2,16,4], index: 17, kind: output, shape index: {}]  }
   0x1   :  { %3089 = sst [smem:[#allocation9_spill]] %s3070_s0  ;;  %v22_v0 = vstv %s3086_s16 }
   0x2   :  { %3090 = sst [smem:[#allocation10_spill]] %s3071_s1  ;;  %23 = vst [vmem:[#allocation2] sm:$0x1] %v22_v0 }
   0x3   :  { %24 = vsyncpa [#allocation4], 0  ;;  %s40_s28 = sshll.u32 %s3075_s5, 4  ;;  %s41_s28 = int_to_ptr.hbm [resolvable:$true] %s40_s28 }
   0x4   :  { %25 = vsyncpa [#allocation6], 0  ;;  %s1935_s29 = smov [#allocation3]   ;;  %s53_s19 = sshll.u32 %s3076_s6, 4  ;;  %s54_s19 = int_to_ptr.hbm [resolvable:$true] %s53_s19 }
   0x5   :  { %s42_s0 = sshll.u32 %s1935_s29, 4  ;;  %s1936_s1 = smov 128   ;;  %s43_s0 = int_to_ptr.vmem [resolvable:$true] %s42_s0 }
   0x6   :  { %s1937_s20 = smov 8   ;;  %s1938_s16 = smov [#allocation5]  }
   0x7   :  { %48 = dma.hbm_to_vmem [thread:$0]  %s41_s28, 4096, %s43_s0, [#allocation4], %s1936_s1, %s1936_s1, %s1937_s20  }
   0x8   :  { %s55_s21 = sshll.u32 %s1938_s16, 4  ;;  %s56_s21 = int_to_ptr.vmem [resolvable:$true] %s55_s21 }
   0x9   :  { %61 = dma.hbm_to_vmem [thread:$0]  %s54_s19, 4096, %s56_s21, [#allocation6], %s1936_s1, %s1936_s1, %s1937_s20  }
   0xa   :  { %1931 = dma.done.wait [#allocation4], 4096  }
   0xb   :  { %1932 = vsyncadd [#allocation4], 4294963200 }
   0xc   :  { %1933 = dma.done.wait [#allocation6], 4096  }
   0xd   :  { %1934 = vsyncadd [#allocation6], 4294963200  ;;  %s3091_s23 = sld [smem:[#allocation10_spill]]  ;;  %vm191_vm0 = vcmask 261120   ;;  %vm605_vm1 = vcmask 1040384   ;;  %vm608_vm2 = vcmask 1041408  }
   0xe   :  { %s3092_s1 = sld [smem:[#allocation9_spill]]  ;;  %vm611_vm3 = vcmask 1042432   ;;  %vm614_vm4 = vcmask 1043456   ;;  %vm617_vm5 = vcmask 1044480   ;;  %vm620_vm6 = vcmask 1045504   ;;  %vm2354_vm11 = vmneg %vm605_vm1  ;;  %s1940_s0 = smov 1  }
   0xf   :  { %vm623_vm7 = vcmask 1046528   ;;  %s1941_s30 = smov 2   ;;  %s1942_s18 = smov 3  }
  0x13   :  { %v139_v1 = vld [vmem:[%s3091_s23 + $0x180] sm:$0xff]  ;;  %v141_v2 = vld [vmem:[%s3091_s23 + $0x190] sm:$0xff]  ;;  %v140_v3 = vld [vmem:[%s3091_s23 + $0x188] sm:$0xff] }
  0x14   :  { %207 = vmatpush.msra.mxu0 %v139_v1  ;;  %247 = vmatpush.msra.mxu2 %v141_v2  ;;  %v142_v4 = vld [vmem:[%s3091_s23 + $0x198] sm:$0xff]  ;;  %v123_v5 = vld [vmem:[%s3091_s23 + $0x100] sm:$0xff]  ;;  %v125_v6 = vld [vmem:[%s3091_s23 + $0x110] sm:$0xff] }
  0x15   :  { %227 = vmatpush.msra.mxu1 %v140_v3  ;;  %267 = vmatpush.msra.mxu3 %v142_v4  ;;  %v124_v7 = vld [vmem:[%s3091_s23 + $0x108] sm:$0xff]  ;;  %v126_v8 = vld [vmem:[%s3091_s23 + $0x118] sm:$0xff]  ;;  %v107_v9 = vld [vmem:[%s3091_s23 + $0x80] sm:$0xff] }
  0x16   :  { %208 = vmatpush.msra.mxu0 %v123_v5  ;;  %248 = vmatpush.msra.mxu2 %v125_v6  ;;  %v109_v10 = vld [vmem:[%s3091_s23 + $0x90] sm:$0xff]  ;;  %v108_v11 = vld [vmem:[%s3091_s23 + $0x88] sm:$0xff]  ;;  %v110_v12 = vld [vmem:[%s3091_s23 + $0x98] sm:$0xff] }
  0x17   :  { %228 = vmatpush.msra.mxu1 %v124_v7  ;;  %268 = vmatpush.msra.mxu3 %v126_v8  ;;  %v91_v13 = vld [vmem:[%s3091_s23] sm:$0xff]  ;;  %v93_v14 = vld [vmem:[%s3091_s23 + $0x10] sm:$0xff]  ;;  %v92_v16 = vld [vmem:[%s3091_s23 + $0x8] sm:$0xff] }
  0x18   :  { %209 = vmatpush.msra.mxu0 %v107_v9  ;;  %249 = vmatpush.msra.mxu2 %v109_v10  ;;  %v2087_v15 = vld [vmem:[%s3092_s1] sm:$0x3]  ;;  %v94_v17 = vld [vmem:[%s3091_s23 + $0x18] sm:$0xff]  ;;  %v145_v18 = vld [vmem:[%s3091_s23 + $0x1b0] sm:$0xff] }
  0x19   :  { %229 = vmatpush.msra.mxu1 %v108_v11  ;;  %269 = vmatpush.msra.mxu3 %v110_v12  ;;  %v143_v19 = vld [vmem:[%s3091_s23 + $0x1a0] sm:$0xff]  ;;  %v146_v20 = vld [vmem:[%s3091_s23 + $0x1b8] sm:$0xff]  ;;  %v144_v21 = vld [vmem:[%s3091_s23 + $0x1a8] sm:$0xff] }
  0x1a   :  { %210 = vmatpush.msra.mxu0 %v91_v13  ;;  %250 = vmatpush.msra.mxu2 %v93_v14  ;;  %v129_v22 = vld [vmem:[%s3091_s23 + $0x130] sm:$0xff]  ;;  %v127_v23 = vld [vmem:[%s3091_s23 + $0x120] sm:$0xff]  ;;  %v130_v24 = vld [vmem:[%s3091_s23 + $0x138] sm:$0xff] }
  0x1b   :  { %1806 = vmatmul.msk.f32.vlgmr.msra.gmra.mxu0 %vm191_vm0, %v2087_v15  ;;  %230 = vmatpush.msra.mxu1 %v92_v16  ;;  %v128_v25 = vld [vmem:[%s3091_s23 + $0x128] sm:$0xff]  ;;  %v113_v26 = vld [vmem:[%s3091_s23 + $0xb0] sm:$0xff]  ;;  %v111_v27 = vld [vmem:[%s3091_s23 + $0xa0] sm:$0xff] }
  0x1c   :  { %1808 = vmatmul.msk.f32.vlgmr.msra.gmra.mxu2 %vm191_vm0, %v2087_v15  ;;  %270 = vmatpush.msra.mxu3 %v94_v17  ;;  %v114_v28 = vld [vmem:[%s3091_s23 + $0xb8] sm:$0xff]  ;;  %v112_v29 = vld [vmem:[%s3091_s23 + $0xa8] sm:$0xff]  ;;  %v97_v30 = vld [vmem:[%s3091_s23 + $0x30] sm:$0xff] }
  0x1d   :  { %327 = vmatpush.msrb.mxu2 %v145_v18  ;;  %1807 = vmatmul.msk.f32.vlgmr.msra.gmra.mxu1 %vm191_vm0, %v2087_v15  ;;  %v95_v31 = vld [vmem:[%s3091_s23 + $0x20] sm:$0xff]  ;;  %v98_v32 = vld [vmem:[%s3091_s23 + $0x38] sm:$0xff]  ;;  %v96_v33 = vld [vmem:[%s3091_s23 + $0x28] sm:$0xff] }
  0x1e   :  { %1809 = vmatmul.msk.f32.vlgmr.msra.gmra.mxu3 %vm191_vm0, %v2087_v15  ;;  %287 = vmatpush.msrb.mxu0 %v143_v19  ;;  %v149_v34 = vld [vmem:[%s3091_s23 + $0x1d0] sm:$0xff]  ;;  %v147_v35 = vld [vmem:[%s3091_s23 + $0x1c0] sm:$0xff]  ;;  %v150_v36 = vld [vmem:[%s3091_s23 + $0x1d8] sm:$0xff] }
  0x1f   :  { %347 = vmatpush.msrb.mxu3 %v146_v20  ;;  %307 = vmatpush.msrb.mxu1 %v144_v21  ;;  %v148_v37 = vld [vmem:[%s3091_s23 + $0x1c8] sm:$0xff]  ;;  %v133_v38 = vld [vmem:[%s3091_s23 + $0x150] sm:$0xff]  ;;  %v131_v39 = vld [vmem:[%s3091_s23 + $0x140] sm:$0xff] }
  0x20   :  { %328 = vmatpush.msrb.mxu2 %v129_v22  ;;  %288 = vmatpush.msrb.mxu0 %v127_v23  ;;  %v134_v40 = vld [vmem:[%s3091_s23 + $0x158] sm:$0xff]  ;;  %v132_v41 = vld [vmem:[%s3091_s23 + $0x148] sm:$0xff]  ;;  %v117_v42 = vld [vmem:[%s3091_s23 + $0xd0] sm:$0xff] }
  0x21   :  { %348 = vmatpush.msrb.mxu3 %v130_v24  ;;  %308 = vmatpush.msrb.mxu1 %v128_v25  ;;  %v115_v43 = vld [vmem:[%s3091_s23 + $0xc0] sm:$0xff]  ;;  %v118_v44 = vld [vmem:[%s3091_s23 + $0xd8] sm:$0xff]  ;;  %v116_v45 = vld [vmem:[%s3091_s23 + $0xc8] sm:$0xff] }
  0x22   :  { %329 = vmatpush.msrb.mxu2 %v113_v26  ;;  %289 = vmatpush.msrb.mxu0 %v111_v27  ;;  %v101_v46 = vld [vmem:[%s3091_s23 + $0x50] sm:$0xff]  ;;  %v99_v47 = vld [vmem:[%s3091_s23 + $0x40] sm:$0xff]  ;;  %v102_v48 = vld [vmem:[%s3091_s23 + $0x58] sm:$0xff] }
  0x23   :  { %349 = vmatpush.msrb.mxu3 %v114_v28  ;;  %309 = vmatpush.msrb.mxu1 %v112_v29  ;;  %v100_v49 = vld [vmem:[%s3091_s23 + $0x48] sm:$0xff]  ;;  %v153_v50 = vld [vmem:[%s3091_s23 + $0x1f0] sm:$0xff]  ;;  %v151_v51 = vld [vmem:[%s3091_s23 + $0x1e0] sm:$0xff] }
  0x24   :  { %330 = vmatpush.msrb.mxu2 %v97_v30  ;;  %290 = vmatpush.msrb.mxu0 %v95_v31  ;;  %v154_v52 = vld [vmem:[%s3091_s23 + $0x1f8] sm:$0xff]  ;;  %v152_v53 = vld [vmem:[%s3091_s23 + $0x1e8] sm:$0xff]  ;;  %v137_v54 = vld [vmem:[%s3091_s23 + $0x170] sm:$0xff] }
  0x25   :  { %350 = vmatpush.msrb.mxu3 %v98_v32  ;;  %1810 = vmatmul.msk.f32.vlgmr.msrb.gmra.mxu0 %vm191_vm0, %v2087_v15  ;;  %v135_v55 = vld [vmem:[%s3091_s23 + $0x160] sm:$0xff]  ;;  %v138_v56 = vld [vmem:[%s3091_s23 + $0x178] sm:$0xff]  ;;  %v136_v57 = vld [vmem:[%s3091_s23 + $0x168] sm:$0xff] }
  0x26   :  { %310 = vmatpush.msrb.mxu1 %v96_v33  ;;  %1812 = vmatmul.msk.f32.vlgmr.msrb.gmra.mxu2 %vm191_vm0, %v2087_v15  ;;  %v121_v58 = vld [vmem:[%s3091_s23 + $0xf0] sm:$0xff]  ;;  %v119_v59 = vld [vmem:[%s3091_s23 + $0xe0] sm:$0xff]  ;;  %v122_v60 = vld [vmem:[%s3091_s23 + $0xf8] sm:$0xff] }
  0x27   :  { %407 = vmatpush.msra.mxu2 %v149_v34  ;;  %1811 = vmatmul.msk.f32.vlgmr.msrb.gmra.mxu1 %vm191_vm0, %v2087_v15  ;;  %v120_v61 = vld [vmem:[%s3091_s23 + $0xe8] sm:$0xff]  ;;  %v105_v62 = vld [vmem:[%s3091_s23 + $0x70] sm:$0xff]  ;;  %v103_v63 = vld [vmem:[%s3091_s23 + $0x60] sm:$0xff] }
  0x28   :  { %1813 = vmatmul.msk.f32.vlgmr.msrb.gmra.mxu3 %vm191_vm0, %v2087_v15  ;;  %367 = vmatpush.msra.mxu0 %v147_v35  ;;  %v106_v0 = vld [vmem:[%s3091_s23 + $0x78] sm:$0xff]  ;;  %v104_v1 = vld [vmem:[%s3091_s23 + $0x68] sm:$0xff]  ;;  %v2274_v4 = vld [vmem:[%s3072_s2] sm:$0xff] }
  0x29   :  { %427 = vmatpush.msra.mxu3 %v150_v36  ;;  %387 = vmatpush.msra.mxu1 %v148_v37  ;;  %v160_v5 = vperm.slane %v2274_v4, 1  ;;  %v161_v6 = vperm.slane %v2274_v4, 2  ;;  %v159_v9 = vperm.slane %v2274_v4, 0  ;;  %v162_v11 = vperm.slane %v2274_v4, 3  ;;  %v2284_v20 = vld [vmem:[%s3072_s2 + $0x8] sm:$0xff] }
  0x2a   :  { %408 = vmatpush.msra.mxu2 %v133_v38  ;;  %368 = vmatpush.msra.mxu0 %v131_v39  ;;  %v168_v30 = vperm.slane %v2284_v20, 1  ;;  %v164_v31 = vperm.slane %v2274_v4, 5  ;;  %v167_v36 = vperm.slane %v2284_v20, 0 }
  0x2b   :  { %428 = vmatpush.msra.mxu3 %v134_v40  ;;  %388 = vmatpush.msra.mxu1 %v132_v41  ;;  %v165_v40 = vperm.slane %v2274_v4, 6 }
  0x2c   :  { %409 = vmatpush.msra.mxu2 %v117_v42  ;;  %369 = vmatpush.msra.mxu0 %v115_v43 }
  0x2d   :  { %429 = vmatpush.msra.mxu3 %v118_v44  ;;  %389 = vmatpush.msra.mxu1 %v116_v45 }
  0x2e   :  { %410 = vmatpush.msra.mxu2 %v101_v46  ;;  %370 = vmatpush.msra.mxu0 %v99_v47  ;;  %v166_v46 = vperm.slane %v2274_v4, 7  ;;  %v169_v47 = vperm.slane %v2284_v20, 2 }
  0x2f   :  { %430 = vmatpush.msra.mxu3 %v102_v48  ;;  %1814 = vmatmul.msk.f32.vlgmr.msra.gmra.mxu0 %vm191_vm0, %v2087_v15 }
  0x30   :  { %390 = vmatpush.msra.mxu1 %v100_v49  ;;  %1816 = vmatmul.msk.f32.vlgmr.msra.gmra.mxu2 %vm191_vm0, %v2087_v15 }
  0x31   :  { %487 = vmatpush.msrb.mxu2 %v153_v50  ;;  %1815 = vmatmul.msk.f32.vlgmr.msra.gmra.mxu1 %vm191_vm0, %v2087_v15 }
  0x32   :  { %1817 = vmatmul.msk.f32.vlgmr.msra.gmra.mxu3 %vm191_vm0, %v2087_v15  ;;  %447 = vmatpush.msrb.mxu0 %v151_v51 }
  0x33   :  { %507 = vmatpush.msrb.mxu3 %v154_v52  ;;  %467 = vmatpush.msrb.mxu1 %v152_v53 }
  0x34   :  { %488 = vmatpush.msrb.mxu2 %v137_v54  ;;  %448 = vmatpush.msrb.mxu0 %v135_v55  ;;  %v170_v54 = vperm.slane %v2284_v20, 3 }
  0x35   :  { %508 = vmatpush.msrb.mxu3 %v138_v56  ;;  %468 = vmatpush.msrb.mxu1 %v136_v57  ;;  %v171_v57 = vperm.slane %v2284_v20, 4 }
  0x36   :  { %489 = vmatpush.msrb.mxu2 %v121_v58  ;;  %449 = vmatpush.msrb.mxu0 %v119_v59  ;;  %v172_v58 = vperm.slane %v2284_v20, 5  ;;  %v173_v59 = vperm.slane %v2284_v20, 6 }
  0x37   :  { %509 = vmatpush.msrb.mxu3 %v122_v60  ;;  %469 = vmatpush.msrb.mxu1 %v120_v61 }
  0x38   :  { %490 = vmatpush.msrb.mxu2 %v105_v62  ;;  %450 = vmatpush.msrb.mxu0 %v103_v63  ;;  %v174_v63 = vperm.slane %v2284_v20, 7 }
  0x39   :  { %510 = vmatpush.msrb.mxu3 %v106_v0  ;;  %1818 = vmatmul.msk.f32.vlgmr.msrb.gmra.mxu0 %vm191_vm0, %v2087_v15 }
  0x3a   :  { %470 = vmatpush.msrb.mxu1 %v104_v1  ;;  %1820 = vmatmul.msk.f32.vlgmr.msrb.gmra.mxu2 %vm191_vm0, %v2087_v15 }
  0x3b   :  { %1819 = vmatmul.msk.f32.vlgmr.msrb.gmra.mxu1 %vm191_vm0, %v2087_v15  ;;  %1821 = vmatmul.msk.f32.vlgmr.msrb.gmra.mxu3 %vm191_vm0, %v2087_v15  ;;  %v163_v15 = vperm.slane %v2274_v4, 4 }
  0x98   :  { %v212_v2 = vpop.f32.mrf.mxu0 }
  0x99   :  { %v213_v16 = vadd.f32 %v212_v2, %v159_v9 }
  0x9a   :  { %v232_v3 = vpop.f32.mrf.mxu1 }
  0x9b   :  { %v233_v10 = vadd.f32 %v232_v3, %v160_v5  ;;  %v516_v24 = vrot.slane %v213_v16, 1 }
  0x9d   :  { %v519_v17 = vrot.slane %v233_v10, 1  ;;  %v549_v21 = vperm.slane %v233_v10, 0 }
  0x9f   :  { %v252_v7 = vpop.f32.mrf.mxu2  ;;  %v550_v25 = vperm.slane %v519_v17, 0  ;;  %v606_v33 = vsel %vm605_vm1, %v213_v16, %v549_v21 }
  0xa0   :  { %v253_v13 = vadd.f32 %v252_v7, %v161_v6 }
  0xa1   :  { %v272_v8 = vpop.f32.mrf.mxu3  ;;  %v607_v37 = vsel %vm605_vm1, %v516_v24, %v550_v25 }
  0xa2   :  { %v292_v12 = vpop.f32.mrf.mxu0  ;;  %v273_v18 = vadd.f32 %v272_v8, %v162_v11  ;;  %v521_v19 = vrot.slane %v253_v13, 1  ;;  %v553_v26 = vperm.slane %v253_v13, 0 }
  0xa3   :  { %v293_v22 = vadd.f32 %v292_v12, %v163_v15 }
  0xa4   :  { %v312_v14 = vpop.f32.mrf.mxu1  ;;  %v523_v27 = vrot.slane %v273_v18, 1  ;;  %v554_v28 = vperm.slane %v521_v19, 0  ;;  %v557_v34 = vperm.slane %v273_v18, 0  ;;  %v609_v38 = vsel %vm608_vm2, %v606_v33, %v553_v26 }
  0xa5   :  { %v525_v35 = vrot.slane %v293_v22, 1  ;;  %v561_v44 = vperm.slane %v293_v22, 0  ;;  %v313_v45 = vadd.f32 %v312_v14, %v164_v31 }
  0xa6   :  { %v558_v39 = vperm.slane %v523_v27, 0  ;;  %v610_v42 = vsel %vm608_vm2, %v607_v37, %v554_v28  ;;  %v612_v48 = vsel %vm611_vm3, %v609_v38, %v557_v34  ;;  %v742_v34 = vld [vmem:[#allocation3 + $0xf8] sm:$0xff] }
  0xa7   :  { %v562_v49 = vperm.slane %v525_v35, 0  ;;  %v615_v60 = vsel %vm614_vm4, %v612_v48, %v561_v44  ;;  %v527_v61 = vrot.slane %v313_v45, 1  ;;  %v565_v1 = vperm.slane %v313_v45, 0  ;;  %v832_v35 = vld [vmem:[#allocation5 + $0x78] sm:$0xff]  ;;  %776 = vmatpush.msra.mxu1 %v742_v34  ;;  %v741_v44 = vld [vmem:[#allocation3 + $0xf0] sm:$0xff]  ;;  %v735_v34 = vld [vmem:[#allocation3 + $0xc0] sm:$0xff] }
  0xa8   :  { %v613_v52 = vsel %vm611_vm3, %v610_v42, %v558_v39  ;;  %849 = vmatpush.msra.mxu2 %v832_v35  ;;  %v831_v45 = vld [vmem:[#allocation5 + $0x70] sm:$0xff]  ;;  %v825_v35 = vld [vmem:[#allocation5 + $0x40] sm:$0xff] }
  0xa9   :  { %v332_v23 = vpop.f32.mrf.mxu2  ;;  %v616_v0 = vsel %vm614_vm4, %v613_v52, %v562_v49  ;;  %v566_v19 = vperm.slane %v527_v61, 0  ;;  %777 = vmatpush.msra.mxu1 %v741_v44  ;;  %v847_v61 = vld [vmem:[#allocation5 + $0xf0] sm:$0xff] }
  0xaa   :  { %v333_v53 = vadd.f32 %v332_v23, %v165_v40  ;;  %v618_v23 = vsel %vm617_vm5, %v615_v60, %v565_v1  ;;  %850 = vmatpush.msra.mxu2 %v831_v45  ;;  %v724_v1 = vld [vmem:[#allocation3 + $0x68] sm:$0xff]  ;;  %v718_v45 = vld [vmem:[#allocation3 + $0x38] sm:$0xff] }
  0xab   :  { %v352_v29 = vpop.f32.mrf.mxu3  ;;  %v619_v39 = vsel %vm617_vm5, %v616_v0, %v566_v19 }
  0xac   :  { %v372_v32 = vpop.f32.mrf.mxu0  ;;  %v529_v5 = vrot.slane %v333_v53, 1  ;;  %v569_v10 = vperm.slane %v333_v53, 0  ;;  %v353_v11 = vadd.f32 %v352_v29, %v166_v46 }
  0xad   :  { %v373_v50 = vadd.f32 %v372_v32, %v167_v36 }
  0xae   :  { %v392_v41 = vpop.f32.mrf.mxu1  ;;  %v531_v27 = vrot.slane %v353_v11, 1  ;;  %v573_v28 = vperm.slane %v353_v11, 0  ;;  %v570_v31 = vperm.slane %v529_v5, 0  ;;  %v621_v32 = vsel %vm620_vm6, %v618_v23, %v569_v10  ;;  %v844_v23 = vld [vmem:[#allocation5 + $0xd8] sm:$0xff] }
  0xaf   :  { %v393_v43 = vadd.f32 %v392_v41, %v168_v30  ;;  %v533_v2 = vrot.slane %v373_v50, 1 }
  0xb0   :  { %v574_v46 = vperm.slane %v531_v27, 0  ;;  %v721_v27 = vld [vmem:[#allocation3 + $0x50] sm:$0xff] }
  0xb1   :  { %v536_v51 = vrot.slane %v393_v43, 1  ;;  %v577_v55 = vperm.slane %v393_v43, 0  ;;  %v726_v43 = vld [vmem:[#allocation3 + $0x78] sm:$0xff] }
  0xb2   :  { %747 = vmatpush.msra.mxu0 %v726_v43 }
  0xb3   :  { %v412_v56 = vpop.f32.mrf.mxu2  ;;  %v578_v3 = vperm.slane %v536_v51, 0  ;;  %v626_v12 = vsel %vm605_vm1, %v373_v50, %v577_v55  ;;  %v848_v50 = vld [vmem:[#allocation5 + $0xf8] sm:$0xff]  ;;  %v622_v51 = vsel %vm620_vm6, %v619_v39, %v570_v31  ;;  %v725_v55 = vld [vmem:[#allocation3 + $0x70] sm:$0xff]  ;;  %v719_v39 = vld [vmem:[#allocation3 + $0x40] sm:$0xff] }
  0xb4   :  { %v413_v62 = vadd.f32 %v412_v56, %v169_v47  ;;  %v2316_v47 = vsel %vm623_vm7, %v621_v32, %v573_v28  ;;  %878 = vmatpush.msra.mxu3 %v848_v50  ;;  %v740_v56 = vld [vmem:[#allocation3 + $0xe8] sm:$0xff]  ;;  %748 = vmatpush.msra.mxu0 %v725_v55  ;;  %v839_v55 = vld [vmem:[#allocation5 + $0xb0] sm:$0xff] }
  0xb5   :  { %v432_v4 = vpop.f32.mrf.mxu3  ;;  %v627_v20 = vsel %vm605_vm1, %v533_v2, %v578_v3  ;;  %778 = vmatpush.msra.mxu1 %v740_v56  ;;  %v739_v2 = vld [vmem:[#allocation3 + $0xe0] sm:$0xff]  ;;  %v736_v28 = vld [vmem:[#allocation3 + $0xc8] sm:$0xff] }
  0xb6   :  { %v538_v6 = vrot.slane %v413_v62, 1  ;;  %v581_v7 = vperm.slane %v413_v62, 0  ;;  %v433_v8 = vadd.f32 %v432_v4, %v170_v54  ;;  %v452_v9 = vpop.f32.mrf.mxu0  ;;  %v649_v62 = vmul.f32 %v2316_v47, %v2316_v47  ;;  %879 = vmatpush.msra.mxu3 %v847_v61  ;;  %v829_v3 = vld [vmem:[#allocation5 + $0x60] sm:$0xff]  ;;  %749 = vmatpush.msra.mxu0 %v724_v1  ;;  %v838_v61 = vld [vmem:[#allocation5 + $0xa8] sm:$0xff]  ;;  %v730_v1 = vld [vmem:[#allocation3 + $0x98] sm:$0xff] }
  0xb7   :  { %v453_v13 = vadd.f32 %v452_v9, %v171_v57  ;;  %v830_v57 = vld [vmem:[#allocation5 + $0x68] sm:$0xff]  ;;  %v2325_v4 = vsel %vm623_vm7, %v622_v51, %v574_v46  ;;  %779 = vmatpush.msra.mxu1 %v739_v2  ;;  %v733_v46 = vld [vmem:[#allocation3 + $0xb0] sm:$0xff]  ;;  %v820_v2 = vld [vmem:[#allocation5 + $0x18] sm:$0xff] }
  0xb8   :  { %v582_v14 = vperm.slane %v538_v6, 0  ;;  %v628_v15 = vsel %vm608_vm2, %v626_v12, %v581_v7  ;;  %v540_v16 = vrot.slane %v433_v8, 1  ;;  %v585_v17 = vperm.slane %v433_v8, 0  ;;  %v472_v18 = vpop.f32.mrf.mxu1  ;;  %851 = vmatpush.msra.mxu2 %v830_v57  ;;  %v846_v8 = vld [vmem:[#allocation5 + $0xe8] sm:$0xff]  ;;  %v723_v12 = vld [vmem:[#allocation3 + $0x60] sm:$0xff] }
  0xb9   :  { %v542_v21 = vrot.slane %v453_v13, 1  ;;  %v473_v22 = vadd.f32 %v472_v18, %v172_v58  ;;  %v589_v26 = vperm.slane %v453_v13, 0  ;;  %880 = vmatpush.msra.mxu3 %v846_v8  ;;  %v738_v13 = vld [vmem:[#allocation3 + $0xd8] sm:$0xff]  ;;  %750 = vmatpush.msra.mxu0 %v723_v12 }
  0xba   :  { %v629_v24 = vsel %vm608_vm2, %v627_v20, %v582_v14  ;;  %v586_v25 = vperm.slane %v540_v16, 0  ;;  %v630_v29 = vsel %vm611_vm3, %v628_v15, %v585_v17  ;;  %852 = vmatpush.msra.mxu2 %v829_v3  ;;  %v828_v14 = vld [vmem:[#allocation5 + $0x58] sm:$0xff]  ;;  %780 = vmatpush.msra.mxu1 %v738_v13  ;;  %v845_v16 = vld [vmem:[#allocation5 + $0xe0] sm:$0xff]  ;;  %v651_v17 = vmul.f32 %v2325_v4, %v2325_v4 }
  0xbb   :  { %v544_v30 = vrot.slane %v473_v22, 1  ;;  %v590_v33 = vperm.slane %v542_v21, 0  ;;  %v593_v37 = vperm.slane %v473_v22, 0  ;;  %v632_v40 = vsel %vm614_vm4, %v630_v29, %v589_v26  ;;  %881 = vmatpush.msra.mxu3 %v845_v16  ;;  %v722_v20 = vld [vmem:[#allocation3 + $0x58] sm:$0xff]  ;;  %v737_v21 = vld [vmem:[#allocation3 + $0xd0] sm:$0xff]  ;;  %v826_v29 = vld [vmem:[#allocation5 + $0x48] sm:$0xff] }
  0xbc   :  { %v631_v36 = vsel %vm611_vm3, %v629_v24, %v586_v25  ;;  %853 = vmatpush.msra.mxu2 %v828_v14  ;;  %v827_v22 = vld [vmem:[#allocation5 + $0x50] sm:$0xff]  ;;  %751 = vmatpush.msra.mxu0 %v722_v20  ;;  %v837_v3 = vld [vmem:[#allocation5 + $0xa0] sm:$0xff]  ;;  %v714_v8 = vld [vmem:[#allocation3 + $0x18] sm:$0xff] }
  0xbd   :  { %v492_v38 = vpop.f32.mrf.mxu2  ;;  %v594_v48 = vperm.slane %v544_v30, 0  ;;  %v633_v52 = vsel %vm614_vm4, %v631_v36, %v590_v33  ;;  %v634_v58 = vsel %vm617_vm5, %v632_v40, %v593_v37  ;;  %781 = vmatpush.msra.mxu1 %v737_v21  ;;  %882 = vmatpush.msra.mxu3 %v844_v23  ;;  %v843_v30 = vld [vmem:[#allocation5 + $0xd0] sm:$0xff]  ;;  %v720_v33 = vld [vmem:[#allocation3 + $0x48] sm:$0xff]  ;;  %v734_v40 = vld [vmem:[#allocation3 + $0xb8] sm:$0xff] }
  0xbe   :  { %v493_v41 = vadd.f32 %v492_v38, %v173_v59  ;;  %v512_v42 = vpop.f32.mrf.mxu3  ;;  %854 = vmatpush.msra.mxu2 %v827_v22  ;;  %752 = vmatpush.msra.mxu0 %v721_v27  ;;  %v842_v36 = vld [vmem:[#allocation5 + $0xc8] sm:$0xff]  ;;  %v713_v14 = vld [vmem:[#allocation3 + $0x10] sm:$0xff]  ;;  %v727_v21 = vld [vmem:[#allocation3 + $0x80] sm:$0xff] }
  0xbf   :  { %v513_v49 = vadd.f32 %v512_v42, %v174_v63  ;;  %v635_v5 = vsel %vm617_vm5, %v633_v52, %v594_v48  ;;  %782 = vmatpush.msra.mxu1 %v736_v28  ;;  %883 = vmatpush.msra.mxu3 %v843_v30  ;;  %v841_v42 = vld [vmem:[#allocation5 + $0xc0] sm:$0xff]  ;;  %v823_v48 = vld [vmem:[#allocation5 + $0x30] sm:$0xff]  ;;  %v728_v16 = vld [vmem:[#allocation3 + $0x88] sm:$0xff] }
  0xc0   :  { %v546_v53 = vrot.slane %v493_v41, 1  ;;  %v597_v54 = vperm.slane %v493_v41, 0  ;;  %855 = vmatpush.msra.mxu2 %v826_v29  ;;  %753 = vmatpush.msra.mxu0 %v720_v33  ;;  %v824_v41 = vld [vmem:[#allocation5 + $0x38] sm:$0xff]  ;;  %v717_v52 = vld [vmem:[#allocation3 + $0x30] sm:$0xff]  ;;  %v712_v20 = vld [vmem:[#allocation3 + $0x8] sm:$0xff] }
  0xc1   :  { %v548_v59 = vrot.slane %v513_v49, 1  ;;  %v601_v60 = vperm.slane %v513_v49, 0  ;;  %783 = vmatpush.msra.mxu1 %v735_v34  ;;  %884 = vmatpush.msra.mxu3 %v842_v36  ;;  %v840_v49 = vld [vmem:[#allocation5 + $0xb8] sm:$0xff]  ;;  %v817_v22 = vld [vmem:[#allocation5] sm:$0xff]  ;;  %v834_v23 = vld [vmem:[#allocation5 + $0x88] sm:$0xff] }
  0xc2   :  { %v598_v63 = vperm.slane %v546_v53, 0  ;;  %v636_v0 = vsel %vm620_vm6, %v634_v58, %v597_v54  ;;  %856 = vmatpush.msra.mxu2 %v825_v35  ;;  %754 = vmatpush.msra.mxu0 %v719_v39  ;;  %v732_v53 = vld [vmem:[#allocation3 + $0xa8] sm:$0xff]  ;;  %v678_v34 = vld [vmem:[%s3073_s3] sm:$0x1] }
  0xc3   :  { %v602_v6 = vperm.slane %v548_v59, 0  ;;  %v2329_v7 = vsel %vm623_vm7, %v636_v0, %v601_v60  ;;  %784 = vmatpush.msra.mxu1 %v734_v40  ;;  %885 = vmatpush.msra.mxu3 %v841_v42  ;;  %v822_v54 = vld [vmem:[#allocation5 + $0x28] sm:$0xff]  ;;  %v731_v59 = vld [vmem:[#allocation3 + $0xa0] sm:$0xff] }
  0xc4   :  { %v637_v9 = vsel %vm620_vm6, %v635_v5, %v598_v63  ;;  %v640_v10 = vadd.f32 %v2329_v7, %v2316_v47  ;;  %v650_v11 = vmul.f32 %v2329_v7, %v2329_v7  ;;  %857 = vmatpush.msra.mxu2 %v824_v41  ;;  %755 = vmatpush.msra.mxu0 %v718_v45  ;;  %v716_v58 = vld [vmem:[#allocation3 + $0x28] sm:$0xff]  ;;  %v821_v60 = vld [vmem:[#allocation5 + $0x20] sm:$0xff] }
  0xc5   :  { %v2337_v15 = vsel %vm623_vm7, %v637_v9, %v602_v6  ;;  %785 = vmatpush.msra.mxu1 %v733_v46  ;;  %886 = vmatpush.msra.mxu3 %v840_v49  ;;  %v715_v0 = vld [vmem:[#allocation3 + $0x20] sm:$0xff]  ;;  %v729_v9 = vld [vmem:[#allocation3 + $0x90] sm:$0xff] }
  0xc6   :  { %v641_v18 = vadd.f32 %v640_v10, %v2325_v4  ;;  %v653_v19 = vadd.f32 %v650_v11, %v649_v62  ;;  %v652_v25 = vmul.f32 %v2337_v15, %v2337_v15  ;;  %858 = vmatpush.msra.mxu2 %v823_v48  ;;  %756 = vmatpush.msra.mxu0 %v717_v52  ;;  %v819_v10 = vld [vmem:[#allocation5 + $0x10] sm:$0xff]  ;;  %v836_v11 = vld [vmem:[#allocation5 + $0x98] sm:$0xff] }
  0xc7   :  { %786 = vmatpush.msra.mxu1 %v732_v53  ;;  %887 = vmatpush.msra.mxu3 %v839_v55 }
  0xc8   :  { %v642_v24 = vadd.f32 %v641_v18, %v2337_v15  ;;  %v654_v26 = vadd.f32 %v653_v19, %v651_v17  ;;  %859 = vmatpush.msra.mxu2 %v822_v54  ;;  %757 = vmatpush.msra.mxu0 %v716_v58  ;;  %v818_v17 = vld [vmem:[#allocation5 + $0x8] sm:$0xff]  ;;  %v835_v18 = vld [vmem:[#allocation5 + $0x90] sm:$0xff] }
  0xc9   :  { %787 = vmatpush.msra.mxu1 %v731_v59  ;;  %888 = vmatpush.msra.mxu3 %v838_v61 }
  0xca   :  { %v643_v31 = vrot.slane %v642_v24, 4  ;;  %v655_v32 = vadd.f32 %v654_v26, %v652_v25  ;;  %860 = vmatpush.msra.mxu2 %v821_v60  ;;  %758 = vmatpush.msra.mxu0 %v715_v0  ;;  %v711_v25 = vld [vmem:[#allocation3] sm:$0xff] }
  0xcb   :  { %788 = vmatpush.msra.mxu1 %v730_v1  ;;  %889 = vmatpush.msra.mxu3 %v837_v3  ;;  %v833_v26 = vld [vmem:[#allocation5 + $0x80] sm:$0xff] }
  0xcc   :  { %v644_v37 = vadd.f32 %v643_v31, %v642_v24  ;;  %v656_v38 = vrot.slane %v655_v32, 4  ;;  %861 = vmatpush.msra.mxu2 %v820_v2  ;;  %759 = vmatpush.msra.mxu0 %v714_v8  ;;  %v1842_v2 = vld [vmem:[%s3077_s7] ss:$0 sm:$0xff] }
  0xcd   :  { %789 = vmatpush.msra.mxu1 %v729_v9  ;;  %890 = vmatpush.msra.mxu3 %v836_v11 }
  0xce   :  { %v645_v43 = vrot.slane %v644_v37, 2  ;;  %v657_v44 = vadd.f32 %v656_v38, %v655_v32  ;;  %862 = vmatpush.msra.mxu2 %v819_v10  ;;  %760 = vmatpush.msra.mxu0 %v713_v14 }
  0xcf   :  { %790 = vmatpush.msra.mxu1 %v728_v16  ;;  %891 = vmatpush.msra.mxu3 %v835_v18 }
  0xd0   :  { %v646_v50 = vadd.f32 %v645_v43, %v644_v37  ;;  %v658_v51 = vrot.slane %v657_v44, 2  ;;  %863 = vmatpush.msra.mxu2 %v818_v17  ;;  %761 = vmatpush.msra.mxu0 %v712_v20  ;;  %v680_v37 = vld [vmem:[%s3074_s4] sm:$0x1] }
  0xd1   :  { %791 = vmatpush.msra.mxu1 %v727_v21  ;;  %892 = vmatpush.msra.mxu3 %v834_v23 }
  0xd2   :  { %v647_v56 = vrot.slane %v646_v50, 1  ;;  %v659_v57 = vadd.f32 %v658_v51, %v657_v44  ;;  %864 = vmatpush.msra.mxu2 %v817_v22  ;;  %762 = vmatpush.msra.mxu0 %v711_v25 }
  0xd3   :  { %893 = vmatpush.msra.mxu3 %v833_v26 }
  0xd4   :  { %v648_v62 = vadd.f32 %v647_v56, %v646_v50  ;;  %v660_v63 = vrot.slane %v659_v57, 1 }
  0xd6   :  { %v661_v5 = vadd.f32 %v660_v63, %v659_v57  ;;  %v662_v6 = vmul.f32 0.03125, %v648_v62 }
  0xd8   :  { %v663_v12 = vmul.f32 0.03125, %v661_v5  ;;  %v664_v13 = vmul.f32 %v662_v6, %v662_v6 }
  0xda   :  { %v665_v19 = vsub.f32 %v663_v12, %v664_v13 }
  0xdc   :  { %v666_v24 = vmax.f32 %v665_v19, 0.0 }
  0xde   :  { %v667_v27 = vadd.f32 1e-05, %v666_v24 }
  0xe0   :  { %1845 = vrsqrt.f32 %v667_v27  ;;  %vm674_vm9 = vweird.f32 %v667_v27 }
  0xe6   :  { %v1846_v28 = vpop.eup %1845 }
  0xe7   :  { %v669_v29 = vmul.f32 %v1846_v28, %v667_v27  ;;  %vm675_vm8 = vweird.f32 %v1846_v28 }
  0xe8   :  { %vm676_vm10 = vmor %vm674_vm9, %vm675_vm8  ;;  %vm1282_vm9 = vcmask 523264  }
  0xe9   :  { %v670_v30 = vmul.f32 %v1846_v28, %v669_v29 }
  0xeb   :  { %v671_v31 = vmul.f32 0.5, %v670_v30 }
  0xed   :  { %v672_v32 = vsub.f32 1.5, %v671_v31 }
  0xef   :  { %v673_v33 = vmul.f32 %v1846_v28, %v672_v32 }
  0xf1   :  { %v677_v35 = vsel %vm676_vm10, %v1846_v28, %v673_v33 }
  0xf2   :  { %v679_v36 = vmul.f32 %v678_v34, %v677_v35 }
  0xf4   :  { %v681_v38 = vmul.f32 %v679_v36, %v662_v6  ;;  %v683_v39 = vperm.slane %v679_v36, 0 }
  0xf6   :  { %v682_v40 = vsub.f32 %v680_v37, %v681_v38  ;;  %v685_v41 = vmul.f32 %v683_v39, %v2329_v7  ;;  %v684_v43 = vmul.f32 %v683_v39, %v2316_v47  ;;  %v687_v47 = vmul.f32 %v683_v39, %v2337_v15  ;;  %v1183_v37 = vld [vmem:[%s3081_s11 + $0x78] sm:$0xff] }
  0xf7   :  { %v686_v52 = vmul.f32 %v683_v39, %v2325_v4  ;;  %v1081_v38 = vld [vmem:[%s3080_s10 + $0xf8] sm:$0xff]  ;;  %1200 = vmatpush.msrb.mxu2 %v1183_v37 }
  0xf8   :  { %v689_v42 = vperm.slane %v682_v40, 0  ;;  %v1199_v39 = vld [vmem:[%s3081_s11 + $0xf8] sm:$0xff]  ;;  %1127 = vmatpush.msrb.mxu1 %v1081_v38 }
  0xf9   :  { %1241 = vmatpush.msrb.mxu3 %v1199_v39  ;;  %v1176_v39 = vld [vmem:[%s3081_s11 + $0x40] sm:$0xff] }
  0xfa   :  { %v692_v44 = vadd.f32 %v689_v42, %v685_v41  ;;  %v691_v45 = vadd.f32 %v689_v42, %v684_v43  ;;  %v694_v54 = vadd.f32 %v689_v42, %v687_v47  ;;  %v693_v55 = vadd.f32 %v689_v42, %v686_v52  ;;  %v1198_v52 = vld [vmem:[%s3081_s11 + $0xf0] sm:$0xff] }
  0xfb   :  { %1242 = vmatpush.msrb.mxu3 %v1198_v52 }
  0xfc   :  { %792 = vmatmul.f32.vlgmr.msra.gmra.mxu1 %v691_v45  ;;  %865 = vmatmul.f32.vlgmr.msra.gmra.mxu2 %v691_v45  ;;  %v699_v48 = vrot.slane %v691_v45, 7  ;;  %v805_v49 = vrot.slane %v691_v45, 1  ;;  %v806_v50 = vrot.slane %v692_v44, 1  ;;  %v700_v51 = vrot.slane %v692_v44, 7 }
  0xfd   :  { %v808_v56 = vrot.slane %v693_v55, 1  ;;  %v809_v57 = vrot.slane %v694_v54, 1  ;;  %v702_v58 = vrot.slane %v693_v55, 7  ;;  %v703_v59 = vrot.slane %v694_v54, 7 }
  0xfe   :  { %1823 = vmatmul.msk.f32.vlgmr.msra.gmra.mxu0 %vm2354_vm11, %v699_v48  ;;  %v807_v7 = vsel %vm623_vm7, %v805_v49, %v806_v50  ;;  %v701_v53 = vsel %vm605_vm1, %v699_v48, %v700_v51  ;;  %v1182_v48 = vld [vmem:[%s3081_s11 + $0x70] sm:$0xff]  ;;  %v1065_v49 = vld [vmem:[%s3080_s10 + $0x78] sm:$0xff] }
  0xff   :  { %894 = vmatmul.f32.vlgmr.msra.gmra.mxu3 %v807_v7  ;;  %v810_v15 = vsel %vm623_vm7, %v808_v56, %v809_v57  ;;  %v704_v4 = vsel %vm605_vm1, %v702_v58, %v703_v59  ;;  %1201 = vmatpush.msrb.mxu2 %v1182_v48  ;;  %v1181_v56 = vld [vmem:[%s3081_s11 + $0x68] sm:$0xff]  ;;  %v1175_v48 = vld [vmem:[%s3081_s11 + $0x38] sm:$0xff] }
 0x100   :  { %1086 = vmatpush.msrb.mxu0 %v1065_v49  ;;  %v1058_v49 = vld [vmem:[%s3080_s10 + $0x40] sm:$0xff] }
 0x101   :  { %1202 = vmatpush.msrb.mxu2 %v1181_v56  ;;  %v1072_v56 = vld [vmem:[%s3080_s10 + $0xb0] sm:$0xff] }
 0x104   :  { %795 = vmatmul.f32.gmra.mxu1 %v692_v44  ;;  %868 = vmatmul.f32.gmra.mxu2 %v692_v44 }
 0x106   :  { %766 = vmatmul.f32.gmra.mxu0 %v701_v53 }
 0x107   :  { %1826 = vmatmul.msk.f32.gmra.mxu3 %vm623_vm7, %v806_v50  ;;  %v1080_v50 = vld [vmem:[%s3080_s10 + $0xf0] sm:$0xff] }
 0x108   :  { %1128 = vmatpush.msrb.mxu1 %v1080_v50  ;;  %v1073_v50 = vld [vmem:[%s3080_s10 + $0xb8] sm:$0xff] }
 0x10c   :  { %798 = vmatmul.f32.gmra.mxu1 %v693_v55  ;;  %871 = vmatmul.f32.gmra.mxu2 %v693_v55 }
 0x10e   :  { %1825 = vmatmul.msk.f32.gmra.mxu0 %vm2354_vm11, %v702_v58  ;;  %v1079_v58 = vld [vmem:[%s3080_s10 + $0xe8] sm:$0xff] }
 0x10f   :  { %900 = vmatmul.f32.gmra.mxu3 %v810_v15  ;;  %1129 = vmatpush.msrb.mxu1 %v1079_v58 }
 0x114   :  { %801 = vmatmul.f32.gmra.mxu1 %v694_v54  ;;  %874 = vmatmul.f32.gmra.mxu2 %v694_v54 }
 0x116   :  { %772 = vmatmul.f32.gmra.mxu0 %v704_v4  ;;  %v1197_v4 = vld [vmem:[%s3081_s11 + $0xe8] sm:$0xff] }
 0x117   :  { %1827 = vmatmul.msk.f32.gmra.mxu3 %vm623_vm7, %v809_v57  ;;  %v1064_v57 = vld [vmem:[%s3080_s10 + $0x70] sm:$0xff] }
 0x118   :  { %1087 = vmatpush.msrb.mxu0 %v1064_v57  ;;  %1243 = vmatpush.msrb.mxu3 %v1197_v4  ;;  %v1190_v57 = vld [vmem:[%s3081_s11 + $0xb0] sm:$0xff]  ;;  %v1173_v4 = vld [vmem:[%s3081_s11 + $0x28] sm:$0xff] }
 0x179   :  { %v793_v60 = vpop.f32.mrf.mxu1 }
 0x17b   :  { %v764_v61 = vpop.f32.mrf.mxu0 }
 0x17c   :  { %v765_v8 = vadd.f32 %v1842_v2, %v764_v61 }
 0x17e   :  { %v2375_v13 = vadd.f32 %v793_v60, %v765_v8 }
 0x17f   :  { %v866_v62 = vpop.f32.mrf.mxu2 }
 0x180   :  { %v867_v18 = vadd.f32 %v1842_v2, %v866_v62  ;;  %v926_v22 = vmul.f32 %v2375_v13, %v2375_v13 }
 0x181   :  { %v796_v63 = vpop.f32.mrf.mxu1 }
 0x182   :  { %v895_v0 = vpop.f32.mrf.mxu3 }
 0x183   :  { %v767_v1 = vpop.f32.mrf.mxu0  ;;  %v2389_v28 = vadd.f32 %v895_v0, %v867_v18  ;;  %v1063_v0 = vld [vmem:[%s3080_s10 + $0x68] sm:$0xff] }
 0x184   :  { %v768_v5 = vadd.f32 %v1842_v2, %v767_v1  ;;  %v1078_v1 = vld [vmem:[%s3080_s10 + $0xe0] sm:$0xff]  ;;  %1088 = vmatpush.msrb.mxu0 %v1063_v0 }
 0x185   :  { %v939_v43 = vmul.f32 %v2389_v28, %v2389_v28  ;;  %1130 = vmatpush.msrb.mxu1 %v1078_v1  ;;  %v1172_v1 = vld [vmem:[%s3081_s11 + $0x20] sm:$0xff] }
 0x186   :  { %v2373_v12 = vadd.f32 %v796_v63, %v768_v5  ;;  %v1180_v63 = vld [vmem:[%s3081_s11 + $0x60] sm:$0xff] }
 0x187   :  { %v869_v3 = vpop.f32.mrf.mxu2  ;;  %1203 = vmatpush.msrb.mxu2 %v1180_v63  ;;  %v1196_v5 = vld [vmem:[%s3081_s11 + $0xe0] sm:$0xff] }
 0x188   :  { %v870_v14 = vadd.f32 %v1842_v2, %v869_v3  ;;  %v927_v19 = vmul.f32 %v2373_v12, %v2373_v12  ;;  %v907_v26 = vadd.f32 %v2373_v12, %v2375_v13  ;;  %1244 = vmatpush.msrb.mxu3 %v1196_v5  ;;  %v1188_v5 = vld [vmem:[%s3081_s11 + $0xa0] sm:$0xff] }
 0x189   :  { %v799_v9 = vpop.f32.mrf.mxu1 }
 0x18a   :  { %v898_v6 = vpop.f32.mrf.mxu3  ;;  %v930_v29 = vadd.f32 %v927_v19, %v926_v22  ;;  %v1061_v22 = vld [vmem:[%s3080_s10 + $0x58] sm:$0xff] }
 0x18b   :  { %v770_v10 = vpop.f32.mrf.mxu0  ;;  %v2383_v23 = vadd.f32 %v898_v6, %v870_v14 }
 0x18c   :  { %v771_v11 = vadd.f32 %v1842_v2, %v770_v10  ;;  %v1062_v10 = vld [vmem:[%s3080_s10 + $0x60] sm:$0xff] }
 0x18d   :  { %v940_v34 = vmul.f32 %v2383_v23, %v2383_v23  ;;  %v916_v44 = vadd.f32 %v2383_v23, %v2389_v28  ;;  %1089 = vmatpush.msrb.mxu0 %v1062_v10  ;;  %v1054_v10 = vld [vmem:[%s3080_s10 + $0x20] sm:$0xff] }
 0x18e   :  { %v2377_v16 = vadd.f32 %v799_v9, %v771_v11  ;;  %v1179_v9 = vld [vmem:[%s3081_s11 + $0x58] sm:$0xff] }
 0x18f   :  { %v872_v17 = vpop.f32.mrf.mxu2  ;;  %v943_v53 = vadd.f32 %v940_v34, %v939_v43  ;;  %v1077_v11 = vld [vmem:[%s3080_s10 + $0xd8] sm:$0xff]  ;;  %1204 = vmatpush.msrb.mxu2 %v1179_v9  ;;  %1090 = vmatpush.msrb.mxu0 %v1061_v22  ;;  %v1075_v34 = vld [vmem:[%s3080_s10 + $0xc8] sm:$0xff] }
 0x190   :  { %v873_v20 = vadd.f32 %v1842_v2, %v872_v17  ;;  %v928_v24 = vmul.f32 %v2377_v16, %v2377_v16  ;;  %v908_v32 = vadd.f32 %v907_v26, %v2377_v16  ;;  %v1195_v17 = vld [vmem:[%s3081_s11 + $0xd8] sm:$0xff]  ;;  %1131 = vmatpush.msrb.mxu1 %v1077_v11  ;;  %v1169_v22 = vld [vmem:[%s3081_s11 + $0x8] sm:$0xff] }
 0x191   :  { %v802_v30 = vpop.f32.mrf.mxu1  ;;  %1245 = vmatpush.msrb.mxu3 %v1195_v17  ;;  %v1171_v9 = vld [vmem:[%s3081_s11 + $0x18] sm:$0xff] }
 0x192   :  { %v901_v21 = vpop.f32.mrf.mxu3  ;;  %v931_v35 = vadd.f32 %v930_v29, %v928_v24  ;;  %v1076_v24 = vld [vmem:[%s3080_s10 + $0xd0] sm:$0xff]  ;;  %v1069_v11 = vld [vmem:[%s3080_s10 + $0x98] sm:$0xff] }
 0x193   :  { %v773_v25 = vpop.f32.mrf.mxu0  ;;  %v2391_v31 = vadd.f32 %v901_v21, %v873_v20  ;;  %v1178_v21 = vld [vmem:[%s3081_s11 + $0x50] sm:$0xff]  ;;  %1132 = vmatpush.msrb.mxu1 %v1076_v24 }
 0x194   :  { %v774_v27 = vadd.f32 %v1842_v2, %v773_v25  ;;  %1205 = vmatpush.msrb.mxu2 %v1178_v21  ;;  %v1194_v25 = vld [vmem:[%s3081_s11 + $0xd0] sm:$0xff] }
 0x195   :  { %v941_v45 = vmul.f32 %v2391_v31, %v2391_v31  ;;  %v917_v54 = vadd.f32 %v916_v44, %v2391_v31  ;;  %1246 = vmatpush.msrb.mxu3 %v1194_v25  ;;  %1133 = vmatpush.msrb.mxu1 %v1075_v34  ;;  %v1186_v21 = vld [vmem:[%s3081_s11 + $0x90] sm:$0xff]  ;;  %v1184_v34 = vld [vmem:[%s3081_s11 + $0x80] sm:$0xff] }
 0x196   :  { %v2394_v33 = vadd.f32 %v802_v30, %v774_v27  ;;  %v1177_v30 = vld [vmem:[%s3081_s11 + $0x48] sm:$0xff]  ;;  %v1052_v24 = vld [vmem:[%s3080_s10 + $0x10] sm:$0xff] }
 0x197   :  { %v875_v36 = vpop.f32.mrf.mxu2  ;;  %v944_v60 = vadd.f32 %v943_v53, %v941_v45  ;;  %1206 = vmatpush.msrb.mxu2 %v1177_v30  ;;  %v1174_v53 = vld [vmem:[%s3081_s11 + $0x30] sm:$0xff]  ;;  %v1051_v30 = vld [vmem:[%s3080_s10 + $0x8] sm:$0xff] }
 0x198   :  { %v909_v40 = vadd.f32 %v908_v32, %v2394_v33  ;;  %v929_v41 = vmul.f32 %v2394_v33, %v2394_v33  ;;  %v876_v42 = vadd.f32 %v1842_v2, %v875_v36  ;;  %v1060_v32 = vld [vmem:[%s3080_s10 + $0x50] sm:$0xff] }
 0x199   :  { %1091 = vmatpush.msrb.mxu0 %v1060_v32  ;;  %1207 = vmatpush.msrb.mxu2 %v1176_v39  ;;  %v1066_v32 = vld [vmem:[%s3080_s10 + $0x80] sm:$0xff] }
 0x19a   :  { %v910_v7 = vrot.slane %v909_v40, 4  ;;  %v932_v51 = vadd.f32 %v931_v35, %v929_v41  ;;  %v904_v47 = vpop.f32.mrf.mxu3  ;;  %v1193_v35 = vld [vmem:[%s3081_s11 + $0xc8] sm:$0xff]  ;;  %v1074_v41 = vld [vmem:[%s3080_s10 + $0xc0] sm:$0xff] }
 0x19b   :  { %v2429_v55 = vadd.f32 %v904_v47, %v876_v42  ;;  %1247 = vmatpush.msrb.mxu3 %v1193_v35  ;;  %v1192_v42 = vld [vmem:[%s3081_s11 + $0xc0] sm:$0xff]  ;;  %1134 = vmatpush.msrb.mxu1 %v1074_v41 }
 0x19c   :  { %v911_v15 = vadd.f32 %v910_v7, %v909_v40  ;;  %v933_v59 = vrot.slane %v932_v51, 4  ;;  %v1059_v40 = vld [vmem:[%s3080_s10 + $0x48] sm:$0xff]  ;;  %1208 = vmatpush.msrb.mxu2 %v1175_v48  ;;  %v1191_v7 = vld [vmem:[%s3081_s11 + $0xb8] sm:$0xff]  ;;  %v971_v48 = vld [vmem:[%s3079_s9] sm:$0x1] }
 0x19d   :  { %v918_v61 = vadd.f32 %v917_v54, %v2429_v55  ;;  %v942_v62 = vmul.f32 %v2429_v55, %v2429_v55  ;;  %1092 = vmatpush.msrb.mxu0 %v1059_v40  ;;  %1248 = vmatpush.msrb.mxu3 %v1192_v42  ;;  %v1057_v54 = vld [vmem:[%s3080_s10 + $0x38] sm:$0xff] }
 0x19e   :  { %v912_v2 = vrot.slane %v911_v15, 2  ;;  %v934_v3 = vadd.f32 %v933_v59, %v932_v51  ;;  %1135 = vmatpush.msrb.mxu1 %v1073_v50  ;;  %1209 = vmatpush.msrb.mxu2 %v1174_v53 }
 0x19f   :  { %v919_v6 = vrot.slane %v918_v61, 4  ;;  %v945_v8 = vadd.f32 %v944_v60, %v942_v62  ;;  %1093 = vmatpush.msrb.mxu0 %v1058_v49  ;;  %1249 = vmatpush.msrb.mxu3 %v1191_v7  ;;  %v1056_v60 = vld [vmem:[%s3080_s10 + $0x30] sm:$0xff]  ;;  %v1189_v62 = vld [vmem:[%s3081_s11 + $0xa8] sm:$0xff] }
 0x1a0   :  { %v935_v14 = vrot.slane %v934_v3, 2  ;;  %v913_v18 = vadd.f32 %v912_v2, %v911_v15  ;;  %1136 = vmatpush.msrb.mxu1 %v1072_v56  ;;  %1210 = vmatpush.msrb.mxu2 %v1173_v4  ;;  %v1055_v2 = vld [vmem:[%s3080_s10 + $0x28] sm:$0xff] }
 0x1a1   :  { %v920_v19 = vadd.f32 %v919_v6, %v918_v61  ;;  %v946_v20 = vrot.slane %v945_v8, 4  ;;  %1094 = vmatpush.msrb.mxu0 %v1057_v54  ;;  %1250 = vmatpush.msrb.mxu3 %v1190_v57  ;;  %v1071_v61 = vld [vmem:[%s3080_s10 + $0xa8] sm:$0xff] }
 0x1a2   :  { %v936_v26 = vadd.f32 %v935_v14, %v934_v3  ;;  %v914_v36 = vrot.slane %v913_v18, 1  ;;  %1137 = vmatpush.msrb.mxu1 %v1071_v61  ;;  %v1070_v3 = vld [vmem:[%s3080_s10 + $0xa0] sm:$0xff]  ;;  %1211 = vmatpush.msrb.mxu2 %v1172_v1  ;;  %v1187_v14 = vld [vmem:[%s3081_s11 + $0x98] sm:$0xff] }
 0x1a3   :  { %v921_v27 = vrot.slane %v920_v19, 2  ;;  %v947_v29 = vadd.f32 %v946_v20, %v945_v8  ;;  %1095 = vmatpush.msrb.mxu0 %v1056_v60  ;;  %1251 = vmatpush.msrb.mxu3 %v1189_v62  ;;  %v1068_v20 = vld [vmem:[%s3080_s10 + $0x90] sm:$0xff] }
 0x1a4   :  { %v937_v43 = vrot.slane %v936_v26, 1  ;;  %v915_v51 = vadd.f32 %v914_v36, %v913_v18  ;;  %1138 = vmatpush.msrb.mxu1 %v1070_v3  ;;  %1212 = vmatpush.msrb.mxu2 %v1171_v9  ;;  %v1170_v18 = vld [vmem:[%s3081_s11 + $0x10] sm:$0xff]  ;;  %v1050_v36 = vld [vmem:[%s3080_s10] sm:$0xff] }
 0x1a5   :  { %v922_v37 = vadd.f32 %v921_v27, %v920_v19  ;;  %v948_v38 = vrot.slane %v947_v29, 2  ;;  %1096 = vmatpush.msrb.mxu0 %v1055_v2  ;;  %1252 = vmatpush.msrb.mxu3 %v1188_v5  ;;  %v1053_v19 = vld [vmem:[%s3080_s10 + $0x18] sm:$0xff]  ;;  %v1185_v27 = vld [vmem:[%s3081_s11 + $0x88] sm:$0xff] }
 0x1a6   :  { %v938_v58 = vadd.f32 %v937_v43, %v936_v26  ;;  %1139 = vmatpush.msrb.mxu1 %v1069_v11  ;;  %1213 = vmatpush.msrb.mxu2 %v1170_v18  ;;  %v1067_v26 = vld [vmem:[%s3080_s10 + $0x88] sm:$0xff]  ;;  %v969_v43 = vld [vmem:[%s3078_s8] sm:$0x1] }
 0x1a7   :  { %v923_v44 = vrot.slane %v922_v37, 1  ;;  %v949_v45 = vadd.f32 %v948_v38, %v947_v29  ;;  %1097 = vmatpush.msrb.mxu0 %v1054_v10  ;;  %1253 = vmatpush.msrb.mxu3 %v1187_v14  ;;  %v1168_v29 = vld [vmem:[%s3081_s11] sm:$0xff] }
 0x1a8   :  { %1140 = vmatpush.msrb.mxu1 %v1068_v20  ;;  %1214 = vmatpush.msrb.mxu2 %v1169_v22 }
 0x1a9   :  { %v924_v47 = vadd.f32 %v923_v44, %v922_v37  ;;  %v950_v52 = vrot.slane %v949_v45, 1  ;;  %1098 = vmatpush.msrb.mxu0 %v1053_v19  ;;  %1254 = vmatpush.msrb.mxu3 %v1186_v21 }
 0x1aa   :  { %1141 = vmatpush.msrb.mxu1 %v1067_v26  ;;  %1215 = vmatpush.msrb.mxu2 %v1168_v29 }
 0x1ab   :  { %v925_v15 = vadd.f32 %v924_v47, %v915_v51  ;;  %v951_v59 = vadd.f32 %v950_v52, %v949_v45  ;;  %1099 = vmatpush.msrb.mxu0 %v1052_v24  ;;  %1255 = vmatpush.msrb.mxu3 %v1185_v27 }
 0x1ac   :  { %1142 = vmatpush.msrb.mxu1 %v1066_v32 }
 0x1ad   :  { %v952_v63 = vadd.f32 %v951_v59, %v938_v58  ;;  %v2542_v0 = vmul.f32 0.015625, %v925_v15  ;;  %1100 = vmatpush.msrb.mxu0 %v1051_v30  ;;  %1256 = vmatpush.msrb.mxu3 %v1184_v34 }
 0x1af   :  { %v954_v6 = vmul.f32 0.015625, %v952_v63  ;;  %v955_v8 = vmul.f32 %v2542_v0, %v2542_v0  ;;  %1101 = vmatpush.msrb.mxu0 %v1050_v36 }
 0x1b1   :  { %v956_v17 = vsub.f32 %v954_v6, %v955_v8 }
 0x1b3   :  { %v957_v25 = vmax.f32 %v956_v17, 0.0 }
 0x1b5   :  { %v958_v35 = vadd.f32 0.8, %v957_v25 }
 0x1b7   :  { %1847 = vrsqrt.f32 %v958_v35  ;;  %vm965_vm13 = vweird.f32 %v958_v35 }
 0x1bd   :  { %v1848_v37 = vpop.eup %1847 }
 0x1be   :  { %v960_v38 = vmul.f32 %v1848_v37, %v958_v35  ;;  %vm966_vm12 = vweird.f32 %v1848_v37 }
 0x1bf   :  { %vm967_vm14 = vmor %vm965_vm13, %vm966_vm12 }
 0x1c0   :  { %v961_v39 = vmul.f32 %v1848_v37, %v960_v38 }
 0x1c2   :  { %v962_v40 = vmul.f32 0.5, %v961_v39 }
 0x1c4   :  { %v963_v41 = vsub.f32 1.5, %v962_v40 }
 0x1c6   :  { %v964_v42 = vmul.f32 %v1848_v37, %v963_v41 }
 0x1c8   :  { %v968_v44 = vsel %vm967_vm14, %v1848_v37, %v964_v42 }
 0x1c9   :  { %v970_v45 = vmul.f32 %v969_v43, %v968_v44 }
 0x1cb   :  { %v972_v49 = vmul.f32 %v970_v45, %v2542_v0  ;;  %v974_v50 = vperm.slane %v970_v45, 0  ;;  %v2637_v45 = vld [vmem:[%s3082_s12] ss:$0 sm:$0xff] }
 0x1cd   :  { %v973_v7 = vsub.f32 %v971_v48, %v972_v49  ;;  %v975_v47 = vmul.f32 %v974_v50, %v2375_v13  ;;  %v998_v52 = vmul.f32 %v974_v50, %v2389_v28  ;;  %v999_v53 = vmul.f32 %v974_v50, %v2383_v23 }
 0x1ce   :  { %v977_v54 = vmul.f32 %v974_v50, %v2377_v16  ;;  %v1000_v56 = vmul.f32 %v974_v50, %v2391_v31  ;;  %v978_v57 = vmul.f32 %v974_v50, %v2394_v33  ;;  %v1001_v58 = vmul.f32 %v974_v50, %v2429_v55 }
 0x1cf   :  { %v980_v51 = vperm.slane %v973_v7, 0  ;;  %v976_v4 = vmul.f32 %v974_v50, %v2373_v12 }
 0x1d1   :  { %v982_v15 = vadd.f32 %v980_v51, %v975_v47  ;;  %v1002_v59 = vadd.f32 %v998_v52, %v980_v51  ;;  %v1003_v60 = vadd.f32 %v999_v53, %v980_v51  ;;  %v984_v61 = vadd.f32 %v980_v51, %v977_v54 }
 0x1d2   :  { %v1004_v62 = vadd.f32 %v1000_v56, %v980_v51  ;;  %v985_v13 = vadd.f32 %v980_v51, %v978_v57  ;;  %v1005_v63 = vadd.f32 %v1001_v58, %v980_v51  ;;  %v983_v16 = vadd.f32 %v980_v51, %v976_v4 }
 0x1d3   :  { %vm986_vm15 = vcmp.ge.f32.partialorder %v982_v15, 0.0  ;;  %v990_v28 = vmul.f32 0.2, %v982_v15  ;;  %vm1006_vm0 = vcmp.ge.f32.partialorder %v1002_v59, 0.0  ;;  %v1010_v23 = vmul.f32 0.2, %v1002_v59 }
 0x1d4   :  { %vm1007_vm2 = vcmp.ge.f32.partialorder %v1003_v60, 0.0  ;;  %v1011_v31 = vmul.f32 0.2, %v1003_v60  ;;  %vm988_vm3 = vcmp.ge.f32.partialorder %v984_v61, 0.0  ;;  %v992_v55 = vmul.f32 0.2, %v984_v61 }
 0x1d5   :  { %v994_v0 = vsel %vm986_vm15, %v982_v15, %v990_v28  ;;  %v1014_v33 = vsel %vm1006_vm0, %v1002_v59, %v1010_v23  ;;  %vm1008_vm4 = vcmp.ge.f32.partialorder %v1004_v62, 0.0  ;;  %v1012_v2 = vmul.f32 0.2, %v1004_v62 }
 0x1d6   :  { %1143 = vmatmul.f32.vlgmr.msrb.gmra.mxu1 %v994_v0  ;;  %1216 = vmatmul.f32.vlgmr.msrb.gmra.mxu2 %v994_v0  ;;  %v1022_v1 = vrot.slane %v1014_v33, 7  ;;  %v996_v12 = vsel %vm988_vm3, %v984_v61, %v992_v55  ;;  %vm989_vm5 = vcmp.ge.f32.partialorder %v985_v13, 0.0  ;;  %v1015_v3 = vsel %vm1007_vm2, %v1003_v60, %v1011_v31 }
 0x1d7   :  { %1257 = vmatmul.f32.vlgmr.msrb.gmra.mxu3 %v1014_v33  ;;  %v993_v5 = vmul.f32 0.2, %v985_v13  ;;  %vm1009_vm6 = vcmp.ge.f32.partialorder %v1005_v63, 0.0  ;;  %v1013_v6 = vmul.f32 0.2, %v1005_v63  ;;  %v1016_v9 = vsel %vm1008_vm4, %v1004_v62, %v1012_v2 }
 0x1d8   :  { %1829 = vmatmul.msk.f32.vlgmr.msrb.gmra.mxu0 %vm2354_vm11, %v1022_v1  ;;  %v991_v8 = vmul.f32 0.2, %v983_v16  ;;  %v1041_v10 = vrot.slane %v996_v12, 1  ;;  %vm987_vm8 = vcmp.ge.f32.partialorder %v983_v16, 0.0  ;;  %v1025_v11 = vrot.slane %v1016_v9, 7 }
 0x1d9   :  { %v997_v14 = vsel %vm989_vm5, %v985_v13, %v993_v5  ;;  %v1017_v17 = vsel %vm1009_vm6, %v1005_v63, %v1013_v6  ;;  %v1023_v18 = vrot.slane %v1015_v3, 7  ;;  %v1038_v26 = vrot.slane %v994_v0, 1 }
 0x1da   :  { %v1026_v19 = vrot.slane %v1017_v17, 7  ;;  %v1042_v20 = vrot.slane %v997_v14, 1  ;;  %v995_v21 = vsel %vm987_vm8, %v983_v16, %v991_v8 }
 0x1db   :  { %v1024_v25 = vsel %vm605_vm1, %v1022_v1, %v1023_v18  ;;  %v1039_v27 = vrot.slane %v995_v21, 1 }
 0x1dc   :  { %v1027_v22 = vsel %vm605_vm1, %v1025_v11, %v1026_v19  ;;  %v1043_v24 = vsel %vm623_vm7, %v1041_v10, %v1042_v20 }
 0x1dd   :  { %v1040_v29 = vsel %vm623_vm7, %v1038_v26, %v1039_v27 }
 0x1de   :  { %1146 = vmatmul.f32.gmra.mxu1 %v995_v21  ;;  %1219 = vmatmul.f32.gmra.mxu2 %v995_v21 }
 0x1df   :  { %1260 = vmatmul.f32.gmra.mxu3 %v1015_v3 }
 0x1e0   :  { %1105 = vmatmul.f32.gmra.mxu0 %v1024_v25 }
 0x1e6   :  { %1149 = vmatmul.f32.gmra.mxu1 %v996_v12  ;;  %1222 = vmatmul.f32.gmra.mxu2 %v996_v12 }
 0x1e7   :  { %1263 = vmatmul.f32.gmra.mxu3 %v1016_v9 }
 0x1e8   :  { %1831 = vmatmul.msk.f32.gmra.mxu0 %vm2354_vm11, %v1025_v11 }
 0x1ee   :  { %1152 = vmatmul.f32.gmra.mxu1 %v997_v14  ;;  %1225 = vmatmul.f32.gmra.mxu2 %v997_v14 }
 0x1ef   :  { %1266 = vmatmul.f32.gmra.mxu3 %v1017_v17 }
 0x1f0   :  { %1111 = vmatmul.f32.gmra.mxu0 %v1027_v22 }
 0x1f6   :  { %1155 = vmatmul.f32.gmra.mxu1 %v1014_v33  ;;  %1228 = vmatmul.f32.gmra.mxu2 %v1014_v33 }
 0x1f7   :  { %1269 = vmatmul.f32.gmra.mxu3 %v1040_v29 }
 0x1f8   :  { %1114 = vmatmul.f32.gmra.mxu0 %v994_v0 }
 0x1fe   :  { %1158 = vmatmul.f32.gmra.mxu1 %v1015_v3  ;;  %1231 = vmatmul.f32.gmra.mxu2 %v1015_v3 }
 0x1ff   :  { %1832 = vmatmul.msk.f32.gmra.mxu3 %vm623_vm7, %v1039_v27 }
 0x200   :  { %1117 = vmatmul.f32.gmra.mxu0 %v995_v21 }
 0x206   :  { %1161 = vmatmul.f32.gmra.mxu1 %v1016_v9  ;;  %1234 = vmatmul.f32.gmra.mxu2 %v1016_v9 }
 0x207   :  { %1275 = vmatmul.f32.gmra.mxu3 %v1043_v24 }
 0x208   :  { %1120 = vmatmul.f32.gmra.mxu0 %v996_v12 }
 0x20e   :  { %1164 = vmatmul.f32.gmra.mxu1 %v1017_v17  ;;  %1237 = vmatmul.f32.gmra.mxu2 %v1017_v17 }
 0x20f   :  { %1833 = vmatmul.msk.f32.gmra.mxu3 %vm623_vm7, %v1042_v20 }
 0x210   :  { %1123 = vmatmul.f32.gmra.mxu0 %v997_v14 }
 0x253   :  { %v1144_v46 = vpop.f32.mrf.mxu1 }
 0x255   :  { %v1103_v30 = vpop.f32.mrf.mxu0 }
 0x256   :  { %v1104_v7 = vadd.f32 %v2637_v45, %v1103_v30 }
 0x258   :  { %v2643_v54 = vadd.f32 %v1144_v46, %v1104_v7 }
 0x259   :  { %v1217_v32 = vpop.f32.mrf.mxu2 }
 0x25a   :  { %v1258_v34 = vpop.f32.mrf.mxu3  ;;  %v1218_v52 = vadd.f32 %v2637_v45, %v1217_v32  ;;  %v1326_v62 = vmul.f32 %v2643_v54, %v2643_v54  ;;  %v1283_v12 = vsel %vm1282_vm9, %v2643_v54, 0.0 }
 0x25b   :  { %v1147_v35 = vpop.f32.mrf.mxu1 }
 0x25c   :  { %v2648_v59 = vadd.f32 %v1258_v34, %v1218_v52  ;;  %v1334_v2 = vsel %vm1282_vm9, %v1326_v62, 0.0 }
 0x25d   :  { %v1106_v36 = vpop.f32.mrf.mxu0 }
 0x25e   :  { %v1107_v47 = vadd.f32 %v2637_v45, %v1106_v36  ;;  %v1355_v16 = vmul.f32 %v2648_v59, %v2648_v59  ;;  %v1304_v3 = vsel %vm1282_vm9, %v2648_v59, 0.0 }
 0x260   :  { %v2645_v57 = vadd.f32 %v1147_v35, %v1107_v47  ;;  %v1363_v17 = vsel %vm1282_vm9, %v1355_v16, 0.0 }
 0x261   :  { %v1220_v37 = vpop.f32.mrf.mxu2 }
 0x262   :  { %v1261_v38 = vpop.f32.mrf.mxu3  ;;  %v1221_v53 = vadd.f32 %v2637_v45, %v1220_v37  ;;  %v1327_v23 = vmul.f32 %v2645_v57, %v2645_v57  ;;  %v1284_v0 = vsel %vm1282_vm9, %v2645_v57, 0.0 }
 0x263   :  { %v1150_v39 = vpop.f32.mrf.mxu1  ;;  %v1285_v18 = vadd.f32 %v1284_v0, %v1283_v12 }
 0x264   :  { %v2650_v60 = vadd.f32 %v1261_v38, %v1221_v53  ;;  %v1335_v8 = vsel %vm1282_vm9, %v1327_v23, 0.0 }
 0x265   :  { %v1109_v40 = vpop.f32.mrf.mxu0  ;;  %v1336_v26 = vadd.f32 %v1335_v8, %v1334_v2 }
 0x266   :  { %v1110_v58 = vadd.f32 %v2637_v45, %v1109_v40  ;;  %v1356_v33 = vmul.f32 %v2650_v60, %v2650_v60  ;;  %v1305_v9 = vsel %vm1282_vm9, %v2650_v60, 0.0 }
 0x267   :  { %v1306_v27 = vadd.f32 %v1305_v9, %v1304_v3 }
 0x268   :  { %v2658_v63 = vadd.f32 %v1150_v39, %v1110_v58  ;;  %v1364_v21 = vsel %vm1282_vm9, %v1356_v33, 0.0 }
 0x269   :  { %v1223_v41 = vpop.f32.mrf.mxu2  ;;  %v1365_v38 = vadd.f32 %v1364_v21, %v1363_v17 }
 0x26a   :  { %v1264_v42 = vpop.f32.mrf.mxu3  ;;  %v1224_v61 = vadd.f32 %v2637_v45, %v1223_v41  ;;  %v1328_v10 = vmul.f32 %v2658_v63, %v2658_v63  ;;  %v1286_v22 = vsel %vm1282_vm9, %v2658_v63, 0.0 }
 0x26b   :  { %v1153_v43 = vpop.f32.mrf.mxu1  ;;  %v1287_v39 = vadd.f32 %v1286_v22, %v1285_v18 }
 0x26c   :  { %v2667_v55 = vadd.f32 %v1264_v42, %v1224_v61  ;;  %v1337_v34 = vsel %vm1282_vm9, %v1328_v10, 0.0 }
 0x26d   :  { %v1112_v44 = vpop.f32.mrf.mxu0 }
 0x26e   :  { %v1113_v13 = vadd.f32 %v2637_v45, %v1112_v44  ;;  %v1357_v24 = vmul.f32 %v2667_v55, %v2667_v55  ;;  %v1307_v35 = vsel %vm1282_vm9, %v2667_v55, 0.0 }
 0x270   :  { %v2675_v5 = vadd.f32 %v1153_v43, %v1113_v13  ;;  %v1366_v42 = vsel %vm1282_vm9, %v1357_v24, 0.0 }
 0x271   :  { %v1226_v48 = vpop.f32.mrf.mxu2 }
 0x272   :  { %v1267_v49 = vpop.f32.mrf.mxu3  ;;  %v1227_v31 = vadd.f32 %v2637_v45, %v1226_v48  ;;  %v1329_v29 = vmul.f32 %v2675_v5, %v2675_v5  ;;  %v1288_v43 = vsel %vm1282_vm9, %v2675_v5, 0.0 }
 0x273   :  { %v1156_v50 = vpop.f32.mrf.mxu1  ;;  %v1289_v61 = vadd.f32 %v1288_v43, %v1287_v39 }
 0x274   :  { %v2684_v19 = vadd.f32 %v1267_v49, %v1227_v31  ;;  %v1338_v49 = vadd.f32 %v1337_v34, %v1336_v26  ;;  %v1339_v7 = vsel %vm1282_vm9, %v1329_v29, 0.0 }
 0x275   :  { %v1115_v51 = vpop.f32.mrf.mxu0 }
 0x276   :  { %v1116_v1 = vadd.f32 %v2637_v45, %v1115_v51  ;;  %v1358_v40 = vmul.f32 %v2684_v19, %v2684_v19  ;;  %v1309_v52 = vsel %vm1282_vm9, %v2684_v19, 0.0  ;;  %v1340_v0 = vadd.f32 %v1339_v7, %v1338_v49 }
 0x278   :  { %v2692_v25 = vadd.f32 %v1156_v50, %v1116_v1  ;;  %v1308_v50 = vadd.f32 %v1307_v35, %v1306_v27  ;;  %v1368_v62 = vsel %vm1282_vm9, %v1358_v40, 0.0 }
 0x279   :  { %v1229_v56 = vpop.f32.mrf.mxu2 }
 0x27a   :  { %v1270_v15 = vpop.f32.mrf.mxu3  ;;  %v1230_v20 = vadd.f32 %v2637_v45, %v1229_v56  ;;  %v1330_v44 = vmul.f32 %v2692_v25, %v2692_v25  ;;  %v1290_v53 = vsel %vm1282_vm9, %v2692_v25, 0.0  ;;  %v1310_v33 = vadd.f32 %v1309_v52, %v1308_v50 }
 0x27b   :  { %v1159_v4 = vpop.f32.mrf.mxu1  ;;  %v1291_v1 = vadd.f32 %v1290_v53, %v1289_v61 }
 0x27c   :  { %v2705_v41 = vadd.f32 %v1270_v15, %v1230_v20 }
 0x27d   :  { %v1118_v28 = vpop.f32.mrf.mxu0 }
 0x27e   :  { %v1119_v11 = vadd.f32 %v2637_v45, %v1118_v28  ;;  %v1359_v13 = vmul.f32 %v2705_v41, %v2705_v41  ;;  %v1341_v28 = vsel %vm1282_vm9, %v1330_v44, 0.0  ;;  %v1311_v3 = vsel %vm1282_vm9, %v2705_v41, 0.0 }
 0x27f   :  { %v1312_v26 = vadd.f32 %v1311_v3, %v1310_v33 }
 0x280   :  { %v2700_v36 = vadd.f32 %v1159_v4, %v1119_v11  ;;  %v1367_v4 = vadd.f32 %v1366_v42, %v1365_v38  ;;  %v1342_v11 = vadd.f32 %v1341_v28, %v1340_v0 }
 0x281   :  { %v1232_v6 = vpop.f32.mrf.mxu2 }
 0x282   :  { %v1273_v14 = vpop.f32.mrf.mxu3  ;;  %v1233_v46 = vadd.f32 %v2637_v45, %v1232_v6  ;;  %v1331_v56 = vmul.f32 %v2700_v36, %v2700_v36  ;;  %v1292_v23 = vsel %vm1282_vm9, %v2700_v36, 0.0  ;;  %v1369_v10 = vadd.f32 %v1368_v62, %v1367_v4 }
 0x283   :  { %v1162_v30 = vpop.f32.mrf.mxu1  ;;  %v1293_v17 = vadd.f32 %v1292_v23, %v1291_v1 }
 0x284   :  { %v2715_v51 = vadd.f32 %v1273_v14, %v1233_v46  ;;  %v1343_v6 = vsel %vm1282_vm9, %v1331_v56, 0.0  ;;  %v1370_v14 = vsel %vm1282_vm9, %v1359_v13, 0.0 }
 0x285   :  { %v1121_v32 = vpop.f32.mrf.mxu0  ;;  %v1344_v27 = vadd.f32 %v1343_v6, %v1342_v11  ;;  %v1371_v38 = vadd.f32 %v1370_v14, %v1369_v10 }
 0x286   :  { %v1122_v37 = vadd.f32 %v2637_v45, %v1121_v32  ;;  %v1360_v12 = vmul.f32 %v2715_v51, %v2715_v51  ;;  %v1313_v20 = vsel %vm1282_vm9, %v2715_v51, 0.0 }
 0x287   :  { %v1314_v39 = vadd.f32 %v1313_v20, %v1312_v26 }
 0x288   :  { %v2712_v48 = vadd.f32 %v1162_v30, %v1122_v37  ;;  %v1372_v29 = vsel %vm1282_vm9, %v1360_v12, 0.0 }
 0x289   :  { %v1235_v47 = vpop.f32.mrf.mxu2  ;;  %v1373_v7 = vadd.f32 %v1372_v29, %v1371_v38 }
 0x28a   :  { %v1236_v58 = vadd.f32 %v2637_v45, %v1235_v47  ;;  %v1276_v15 = vpop.f32.mrf.mxu3  ;;  %v1332_v16 = vmul.f32 %v2712_v48, %v2712_v48  ;;  %v1294_v8 = vsel %vm1282_vm9, %v2712_v48, 0.0 }
 0x28b   :  { %v1165_v18 = vpop.f32.mrf.mxu1  ;;  %v1295_v46 = vadd.f32 %v1294_v8, %v1293_v17 }
 0x28c   :  { %v2732_v31 = vadd.f32 %v1276_v15, %v1236_v58  ;;  %v1345_v21 = vsel %vm1282_vm9, %v1332_v16, 0.0 }
 0x28d   :  { %v1124_v2 = vpop.f32.mrf.mxu0  ;;  %v1346_v40 = vadd.f32 %v1345_v21, %v1344_v27 }
 0x28e   :  { %v1125_v9 = vadd.f32 %v2637_v45, %v1124_v2  ;;  %v1361_v22 = vmul.f32 %v2732_v31, %v2732_v31  ;;  %v1315_v32 = vsel %vm1282_vm9, %v2732_v31, 0.0 }
 0x28f   :  { %v1316_v47 = vadd.f32 %v1315_v32, %v1314_v39 }
 0x290   :  { %v2748_v24 = vadd.f32 %v1165_v18, %v1125_v9  ;;  %v1374_v44 = vsel %vm1282_vm9, %v1361_v22, 0.0 }
 0x291   :  { %v1238_v30 = vpop.f32.mrf.mxu2  ;;  %v1375_v58 = vadd.f32 %v1374_v44, %v1373_v7 }
 0x292   :  { %v1296_v34 = vsel %vm1282_vm9, %v2748_v24, 0.0  ;;  %v1333_v35 = vmul.f32 %v2748_v24, %v2748_v24  ;;  %v1239_v37 = vadd.f32 %v2637_v45, %v1238_v30  ;;  %v1279_v43 = vpop.f32.mrf.mxu3 }
 0x293   :  { %v1297_v42 = vadd.f32 %v1296_v34, %v1295_v46 }
 0x294   :  { %v1347_v49 = vsel %vm1282_vm9, %v1333_v35, 0.0  ;;  %v2760_v50 = vadd.f32 %v1279_v43, %v1239_v37 }
 0x295   :  { %v1298_v52 = vrot.slane %v1297_v42, 4  ;;  %v1348_v53 = vadd.f32 %v1347_v49, %v1346_v40  ;;  %v1401_v49 = vld [vmem:[%s3083_s13] sm:$0x1]  ;;  %s1939_s13 = smov 64  }
 0x296   :  { %v1317_v56 = vsel %vm1282_vm9, %v2760_v50, 0.0  ;;  %v1362_v45 = vmul.f32 %v2760_v50, %v2760_v50 }
 0x297   :  { %v1299_v15 = vadd.f32 %v1298_v52, %v1297_v42  ;;  %v1349_v4 = vrot.slane %v1348_v53, 4  ;;  %v1318_v61 = vadd.f32 %v1317_v56, %v1316_v47  ;;  %v1403_v52 = vld [vmem:[%s3084_s14] sm:$0x1] }
 0x298   :  { %v1376_v62 = vsel %vm1282_vm9, %v1362_v45, 0.0 }
 0x299   :  { %v1300_v13 = vrot.slane %v1299_v15, 2  ;;  %v1350_v28 = vadd.f32 %v1349_v4, %v1348_v53  ;;  %v1319_v23 = vrot.slane %v1318_v61, 4  ;;  %v1377_v16 = vadd.f32 %v1376_v62, %v1375_v58 }
 0x29b   :  { %v1301_v0 = vadd.f32 %v1300_v13, %v1299_v15  ;;  %v1351_v33 = vrot.slane %v1350_v28, 2  ;;  %v1320_v1 = vadd.f32 %v1319_v23, %v1318_v61  ;;  %v1378_v12 = vrot.slane %v1377_v16, 4 }
 0x29d   :  { %v1352_v2 = vadd.f32 %v1351_v33, %v1350_v28  ;;  %v1321_v3 = vrot.slane %v1320_v1, 2  ;;  %v1379_v6 = vadd.f32 %v1378_v12, %v1377_v16  ;;  %v1302_v8 = vrot.slane %v1301_v0, 1 }
 0x29f   :  { %v1322_v9 = vadd.f32 %v1321_v3, %v1320_v1  ;;  %v1380_v10 = vrot.slane %v1379_v6, 2  ;;  %v1353_v11 = vrot.slane %v1352_v2, 1  ;;  %v1303_v18 = vadd.f32 %v1302_v8, %v1301_v0 }
 0x2a1   :  { %v1323_v14 = vrot.slane %v1322_v9, 1  ;;  %v1381_v17 = vadd.f32 %v1380_v10, %v1379_v6  ;;  %v1354_v22 = vadd.f32 %v1353_v11, %v1352_v2 }
 0x2a3   :  { %v1324_v20 = vadd.f32 %v1323_v14, %v1322_v9  ;;  %v1382_v21 = vrot.slane %v1381_v17, 1 }
 0x2a5   :  { %v1325_v26 = vadd.f32 %v1324_v20, %v1303_v18  ;;  %v1383_v27 = vadd.f32 %v1382_v21, %v1381_v17 }
 0x2a7   :  { %v1384_v29 = vadd.f32 %v1383_v27, %v1354_v22  ;;  %v1385_v46 = vmul.f32 0.0078125, %v1325_v26 }
 0x2a9   :  { %v1386_v30 = vmul.f32 0.0078125, %v1384_v29  ;;  %v1387_v32 = vmul.f32 %v1385_v46, %v1385_v46 }
 0x2ab   :  { %v1388_v34 = vsub.f32 %v1386_v30, %v1387_v32 }
 0x2ad   :  { %v1389_v35 = vmax.f32 %v1388_v34, 0.0 }
 0x2af   :  { %v1390_v37 = vadd.f32 0.8, %v1389_v35 }
 0x2b1   :  { %1849 = vrsqrt.f32 %v1390_v37  ;;  %vm1397_vm11 = vweird.f32 %v1390_v37 }
 0x2b7   :  { %v1850_v38 = vpop.eup %1849 }
 0x2b8   :  { %v1392_v39 = vmul.f32 %v1850_v38, %v1390_v37  ;;  %vm1398_vm10 = vweird.f32 %v1850_v38 }
 0x2b9   :  { %vm1399_vm12 = vmor %vm1397_vm11, %vm1398_vm10 }
 0x2ba   :  { %v1393_v40 = vmul.f32 %v1850_v38, %v1392_v39 }
 0x2bc   :  { %v1394_v42 = vmul.f32 0.5, %v1393_v40 }
 0x2be   :  { %v1395_v43 = vsub.f32 1.5, %v1394_v42 }
 0x2c0   :  { %v1396_v44 = vmul.f32 %v1850_v38, %v1395_v43 }
 0x2c2   :  { %v1400_v7 = vsel %vm1399_vm12, %v1850_v38, %v1396_v44 }
 0x2c3   :  { %v1402_v47 = vmul.f32 %v1401_v49, %v1400_v7 }
 0x2c5   :  { %v1404_v53 = vmul.f32 %v1402_v47, %v1385_v46  ;;  %v2773_v56 = vperm.slane %v1402_v47, 0 }
 0x2c7   :  { %v1405_v45 = vsub.f32 %v1403_v52, %v1404_v53  ;;  %v1450_v15 = vmul.f32 %v2773_v56, %v2648_v59  ;;  %v1409_v4 = vmul.f32 %v2773_v56, %v2658_v63  ;;  %v1407_v61 = vmul.f32 %v2773_v56, %v2643_v54 }
 0x2c8   :  { %v1451_v23 = vmul.f32 %v2773_v56, %v2650_v60  ;;  %v1410_v16 = vmul.f32 %v2773_v56, %v2675_v5  ;;  %v1408_v54 = vmul.f32 %v2773_v56, %v2645_v57  ;;  %v1456_v57 = vmul.f32 %v2773_v56, %v2732_v31 }
 0x2c9   :  { %v2775_v58 = vperm.slane %v1405_v45, 0  ;;  %v1452_v8 = vmul.f32 %v2773_v56, %v2667_v55  ;;  %v1455_v9 = vmul.f32 %v2773_v56, %v2715_v51  ;;  %v1411_v14 = vmul.f32 %v2773_v56, %v2692_v25 }
 0x2ca   :  { %v1413_v18 = vmul.f32 %v2773_v56, %v2712_v48  ;;  %v1457_v26 = vmul.f32 %v2773_v56, %v2760_v50  ;;  %v1453_v46 = vmul.f32 %v2773_v56, %v2684_v19  ;;  %v1454_v30 = vmul.f32 %v2773_v56, %v2705_v41 }
 0x2cb   :  { %v1458_v62 = vadd.f32 %v1450_v15, %v2775_v58  ;;  %v1420_v13 = vadd.f32 %v2775_v58, %v1409_v4  ;;  %v1418_v28 = vadd.f32 %v2775_v58, %v1407_v61  ;;  %v1459_v12 = vadd.f32 %v1451_v23, %v2775_v58 }
 0x2cc   :  { %v1421_v60 = vadd.f32 %v2775_v58, %v1410_v16  ;;  %v1419_v2 = vadd.f32 %v2775_v58, %v1408_v54  ;;  %v1464_v11 = vadd.f32 %v1456_v57, %v2775_v58  ;;  %v1463_v17 = vadd.f32 %v1455_v9, %v2775_v58 }
 0x2cd   :  { %vm1466_vm13 = vcmp.ge.f32.partialorder %v1458_v62, 0.0  ;;  %v1474_v59 = vmul.f32 0.2, %v1458_v62  ;;  %vm1428_vm14 = vcmp.ge.f32.partialorder %v1420_v13, 0.0  ;;  %v1436_v0 = vmul.f32 0.2, %v1420_v13 }
 0x2ce   :  { %vm1426_vm15 = vcmp.ge.f32.partialorder %v1418_v28, 0.0  ;;  %v1434_v63 = vmul.f32 0.2, %v1418_v28  ;;  %v1475_v3 = vmul.f32 0.2, %v1459_v12  ;;  %vm1467_vm0 = vcmp.ge.f32.partialorder %v1459_v12, 0.0 }
 0x2cf   :  { %v2792_v33 = vsel %vm1466_vm13, %v1458_v62, %v1474_v59  ;;  %v2794_v1 = vsel %vm1428_vm14, %v1420_v13, %v1436_v0  ;;  %v1437_v6 = vmul.f32 0.2, %v1421_v60  ;;  %vm1429_vm2 = vcmp.ge.f32.partialorder %v1421_v60, 0.0 }
 0x2d0   :  { %1589 = vrot.lane.b32.xlu2 %v2792_v33, %s1939_s13  ;;  %1528 = vrot.lane.b32.xlu1 %v2794_v1, %s1939_s13  ;;  %v2802_v5 = vsel %vm1426_vm15, %v1418_v28, %v1434_v63  ;;  %v1435_v10 = vmul.f32 0.2, %v1419_v2  ;;  %vm1427_vm3 = vcmp.ge.f32.partialorder %v1419_v2, 0.0  ;;  %v1460_v31 = vadd.f32 %v1452_v8, %v2775_v58 }
 0x2d1   :  { %1524 = vrot.lane.b32.xlu0 %v2802_v5, %s1939_s13  ;;  %v2820_v55 = vsel %vm1467_vm0, %v1459_v12, %v1475_v3  ;;  %v2822_v20 = vsel %vm1429_vm2, %v1421_v60, %v1437_v6  ;;  %v1422_v51 = vadd.f32 %v2775_v58, %v1411_v14  ;;  %v1424_v21 = vadd.f32 %v2775_v58, %v1413_v18 }
 0x2d2   :  { %v2829_v25 = vsel %vm1427_vm3, %v1419_v2, %v1435_v10  ;;  %v1480_v22 = vmul.f32 0.2, %v1464_v11  ;;  %v1479_v48 = vmul.f32 0.2, %v1463_v17  ;;  %vm1472_vm4 = vcmp.ge.f32.partialorder %v1464_v11, 0.0 }
 0x2d3   :  { %v1476_v27 = vmul.f32 0.2, %v1460_v31  ;;  %vm1471_vm5 = vcmp.ge.f32.partialorder %v1463_v17, 0.0  ;;  %vm1468_vm6 = vcmp.ge.f32.partialorder %v1460_v31, 0.0  ;;  %v1438_v29 = vmul.f32 0.2, %v1422_v51 }
 0x2d4   :  { %vm1430_vm8 = vcmp.ge.f32.partialorder %v1422_v51, 0.0  ;;  %v1440_v32 = vmul.f32 0.2, %v1424_v21  ;;  %v2840_v34 = vsel %vm1472_vm4, %v1464_v11, %v1480_v22  ;;  %v1465_v35 = vadd.f32 %v1457_v26, %v2775_v58 }
 0x2d5   :  { %vm1432_vm10 = vcmp.ge.f32.partialorder %v1424_v21, 0.0  ;;  %v2843_v37 = vsel %vm1471_vm5, %v1463_v17, %v1479_v48  ;;  %v1462_v50 = vadd.f32 %v1454_v30, %v2775_v58  ;;  %v2846_v38 = vsel %vm1468_vm6, %v1460_v31, %v1476_v27 }
 0x2d6   :  { %v1461_v39 = vadd.f32 %v1453_v46, %v2775_v58  ;;  %vm1473_vm11 = vcmp.ge.f32.partialorder %v1465_v35, 0.0  ;;  %v1481_v19 = vmul.f32 0.2, %v1465_v35  ;;  %v2849_v40 = vsel %vm1430_vm8, %v1422_v51, %v1438_v29 }
 0x2d7   :  { %v1499_v41 = vrot.slane %v2840_v34, 7  ;;  %vm1470_vm12 = vcmp.ge.f32.partialorder %v1462_v50, 0.0  ;;  %v1478_v42 = vmul.f32 0.2, %v1462_v50  ;;  %v2856_v43 = vsel %vm1432_vm10, %v1424_v21, %v1440_v32 }
 0x2d8   :  { %1591 = vrot.lane.b32.xlu2 %v2820_v55, %s1939_s13  ;;  %1530 = vrot.lane.b32.xlu1 %v2822_v20, %s1939_s13  ;;  %v1497_v44 = vrot.slane %v2843_v37, 7  ;;  %v2859_v49 = vsel %vm1473_vm11, %v1465_v35, %v1481_v19  ;;  %v1477_v53 = vmul.f32 0.2, %v1461_v39  ;;  %vm1469_vm13 = vcmp.ge.f32.partialorder %v1461_v39, 0.0 }
 0x2d9   :  { %1526 = vrot.lane.b32.xlu0 %v2829_v25, %s1939_s13  ;;  %v2863_v7 = vsel %vm1470_vm12, %v1462_v50, %v1478_v42  ;;  %v1500_v47 = vrot.slane %v2859_v49, 7  ;;  %v1412_v4 = vmul.f32 %v2773_v56, %v2700_v36  ;;  %v1414_v28 = vmul.f32 %v2773_v56, %v2748_v24 }
 0x2da   :  { %v1496_v52 = vrot.slane %v2863_v7, 7  ;;  %v2871_v61 = vsel %vm1469_vm13, %v1461_v39, %v1477_v53  ;;  %v1507_v57 = vsel %vm605_vm1, 0.0, %v1499_v41  ;;  %vm1795_vm0 = vcmask 31768  }
 0x2db   :  { %v1501_v45 = vsel %vm605_vm1, %v1499_v41, %v1500_v47  ;;  %v1423_v62 = vadd.f32 %v2775_v58, %v1412_v4  ;;  %v1425_v36 = vadd.f32 %v2775_v58, %v1414_v28  ;;  %v1490_v58 = vld [vmem:[%s3085_s15] sm:$0x3] }
 0x2dc   :  { %v1498_v15 = vsel %vm605_vm1, %v1496_v52, %v1497_v44  ;;  %v2898_v63 = vperm.slane %v1490_v58, 1  ;;  %v2904_v60 = vperm.slane %v1490_v58, 0  ;;  %v1506_v8 = vsel %vm605_vm1, 0.0, %v1496_v52 }
 0x2dd   :  { %v1439_v13 = vmul.f32 0.2, %v1423_v62  ;;  %vm1431_vm14 = vcmp.ge.f32.partialorder %v1423_v62, 0.0  ;;  %v1441_v16 = vmul.f32 0.2, %v1425_v36  ;;  %vm1433_vm15 = vcmp.ge.f32.partialorder %v1425_v36, 0.0 }
 0x2de   :  { %v1550_v54 = vmul.f32 %v2898_v63, %v2846_v38  ;;  %v1546_v12 = vmul.f32 %v2898_v63, %v2792_v33  ;;  %v1606_v22 = vmul.f32 %v2898_v63, %v2849_v40  ;;  %v1552_v48 = vmul.f32 %v2898_v63, %v2871_v61 }
 0x2df   :  { %v2882_v23 = vsel %vm1431_vm14, %v1423_v62, %v1439_v13  ;;  %v2887_v59 = vsel %vm1433_vm15, %v1425_v36, %v1441_v16  ;;  %v1548_v26 = vmul.f32 %v2898_v63, %v2820_v55  ;;  %v1610_v4 = vmul.f32 %v2898_v63, %v2856_v43 }
 0x2e0   :  { %1593 = vrot.lane.b32.xlu2 %v2846_v38, %s1939_s13  ;;  %1662 = vrot.lane.b32.xlu1 %v2849_v40, %s1939_s13  ;;  %v1561_v17 = vsel %vm1282_vm9, %v1550_v54, 0.0  ;;  %v1553_v18 = vsel %vm1282_vm9, %v1546_v12, 0.0  ;;  %v1565_v19 = vsel %vm1282_vm9, %v1552_v48, 0.0  ;;  %v1613_v41 = vsel %vm1282_vm9, %v1606_v22, 0.0 }
 0x2e1   :  { %1666 = vrot.lane.b32.xlu0 %v2856_v43, %s1939_s13  ;;  %v1557_v44 = vsel %vm1282_vm9, %v1548_v26, 0.0  ;;  %v1608_v62 = vmul.f32 %v2898_v63, %v2882_v23  ;;  %v1612_v13 = vmul.f32 %v2898_v63, %v2887_v59  ;;  %v1621_v54 = vsel %vm1282_vm9, %v1610_v4, 0.0 }
 0x2e2   :  { %vm1580_vm1 = vcmask 7168  }
 0x2e8   :  { %1595 = vrot.lane.b32.xlu2 %v2871_v61, %s1939_s13  ;;  %1733 = vrot.lane.b32.xlu1 %v2843_v37, %s1939_s13 }
 0x2e9   :  { %1735 = vrot.lane.b32.xlu0 %v2840_v34, %s1939_s13 }
 0x2f0   :  { %1664 = vrot.lane.b32.xlu2 %v2882_v23, %s1939_s13 }
 0x2f8   :  { %1668 = vrot.lane.b32.xlu2 %v2887_v59, %s1939_s13 }
 0x300   :  { %1731 = vrot.lane.b32.xlu2 %v2863_v7, %s1939_s13 }
 0x308   :  { %1737 = vrot.lane.b32.xlu2 %v2859_v49, %s1939_s13 }
 0x32a   :  { %v1590_v24 = vpop.permute.xlu2 %1589 }
 0x32b   :  { %v1601_v51 = vsel %vm1282_vm9, %v2802_v5, %v1590_v24 }
 0x32c   :  { %v1605_v27 = vmul.f32 %v1601_v51, %v2904_v60 }
 0x32e   :  { %v1614_v47 = vadd.f32 %v1613_v41, %v1605_v27 }
 0x332   :  { %v1592_v56 = vpop.permute.xlu2 %1591 }
 0x333   :  { %v1602_v52 = vsel %vm1282_vm9, %v2829_v25, %v1592_v56 }
 0x334   :  { %v1607_v28 = vmul.f32 %v1602_v52, %v2904_v60 }
 0x33a   :  { %v1594_v0 = vpop.permute.xlu2 %1593 }
 0x33b   :  { %v1603_v53 = vsel %vm1282_vm9, %v2794_v1, %v1594_v0  ;;  %v1617_v0 = vsel %vm1282_vm9, %v1608_v62, 0.0 }
 0x33c   :  { %v1609_v36 = vmul.f32 %v1603_v53, %v2904_v60  ;;  %v1618_v12 = vadd.f32 %v1617_v0, %v1607_v28 }
 0x342   :  { %v1596_v2 = vpop.permute.xlu2 %1595  ;;  %v1529_v3 = vpop.permute.xlu1 %1528 }
 0x343   :  { %v1538_v6 = vsel %vm1282_vm9, %v1507_v57, %v1529_v3  ;;  %v1525_v9 = vpop.permute.xlu0 %1524  ;;  %v1622_v57 = vadd.f32 %v1621_v54, %v1609_v36 }
 0x344   :  { %v1549_v10 = vmul.f32 %v2904_v60, %v1538_v6  ;;  %v1536_v11 = vsel %vm1282_vm9, %v1506_v8, %v1525_v9 }
 0x345   :  { %v1545_v14 = vmul.f32 %v2904_v60, %v1536_v11  ;;  %v1681_v11 = vmul.f32 %v2898_v63, %v2843_v37 }
 0x346   :  { %v1562_v31 = vadd.f32 %v1561_v17, %v1549_v10  ;;  %v1512_v10 = vrot.slane %v2802_v5, 1 }
 0x347   :  { %v1554_v21 = vadd.f32 %v1553_v18, %v1545_v14  ;;  %v1679_v14 = vmul.f32 %v2898_v63, %v2863_v7  ;;  %v1690_v37 = vsel %vm1282_vm9, %v1681_v11, 0.0 }
 0x348   :  { %1563 = vadd.xlane.f32.xlu0 %v1562_v31 }
 0x349   :  { %1555 = vadd.xlane.f32.xlu2 %v1554_v21  ;;  %v1686_v51 = vsel %vm1282_vm9, %v1679_v14, 0.0 }
 0x34a   :  { %v1665_v29 = vpop.permute.xlu2 %1664  ;;  %v1531_v46 = vpop.permute.xlu1 %1530 }
 0x34b   :  { %v1539_v30 = vsel %vm1282_vm9, %v1501_v45, %v1531_v46  ;;  %v1527_v32 = vpop.permute.xlu0 %1526  ;;  %v1675_v3 = vsel %vm1282_vm9, %v2820_v55, %v1665_v29  ;;  %v1513_v55 = vrot.slane %v2829_v25, 1  ;;  %v1515_v46 = vrot.slane %v2794_v1, 1 }
 0x34c   :  { %v1551_v35 = vmul.f32 %v2904_v60, %v1539_v30  ;;  %v1537_v50 = vsel %vm1282_vm9, %v1498_v15, %v1527_v32  ;;  %v1604_v15 = vsel %vm1282_vm9, %v2822_v20, %v1596_v2  ;;  %v1625_v2 = vsel %vm1282_vm9, %v1612_v13, 0.0 }
 0x34d   :  { %v1547_v39 = vmul.f32 %v2904_v60, %v1537_v50  ;;  %v1611_v24 = vmul.f32 %v1604_v15, %v2904_v60  ;;  %v1680_v17 = vmul.f32 %v1675_v3, %v2904_v60  ;;  %v1514_v25 = vsel %vm623_vm7, %v1512_v10, %v1513_v55 }
 0x34e   :  { %v1566_v42 = vadd.f32 %v1565_v19, %v1551_v35  ;;  %v1522_v27 = vsel %vm623_vm7, %v1513_v55, 0.0  ;;  %v1516_v30 = vrot.slane %v2822_v20, 1  ;;  %v1685_v32 = vmul.f32 %v2898_v63, %v2859_v49 }
 0x34f   :  { %v1558_v45 = vadd.f32 %v1557_v44, %v1547_v39  ;;  %v1626_v8 = vadd.f32 %v1625_v2, %v1611_v24  ;;  %v1691_v22 = vadd.f32 %v1690_v37, %v1680_v17  ;;  %v1750_v50 = vmul.f32 %v2898_v63, %v1522_v27 }
 0x350   :  { %1567 = vadd.xlane.f32.xlu1 %v1566_v42  ;;  %1615 = vadd.xlane.f32.xlu0 %v1614_v47  ;;  %v1698_v1 = vsel %vm1282_vm9, %v1685_v32, 0.0  ;;  %v1517_v41 = vsel %vm623_vm7, %v1515_v46, %v1516_v30  ;;  %v1523_v47 = vsel %vm623_vm7, %v1516_v30, 0.0  ;;  %vm1653_vm7 = vcmask 15368  }
 0x351   :  { %1559 = vadd.xlane.f32.xlu2 %v1558_v45  ;;  %v1759_v42 = vsel %vm1282_vm9, %v1750_v50, 0.0  ;;  %v1752_v15 = vmul.f32 %v2898_v63, %v1517_v41  ;;  %v1754_v4 = vmul.f32 %v2898_v63, %v1523_v47 }
 0x352   :  { %v1669_v16 = vpop.permute.xlu2 %1668  ;;  %v1663_v56 = vpop.permute.xlu1 %1662 }
 0x353   :  { %v1667_v58 = vpop.permute.xlu0 %1666  ;;  %v1674_v6 = vsel %vm1282_vm9, %v2792_v33, %v1663_v56  ;;  %v1683_v33 = vmul.f32 %v2898_v63, %v2840_v34  ;;  %v1677_v34 = vsel %vm1282_vm9, %v2871_v61, %v1669_v16  ;;  %v1748_v61 = vmul.f32 %v2898_v63, %v1514_v25 }
 0x354   :  { %v1676_v9 = vsel %vm1282_vm9, %v2846_v38, %v1667_v58  ;;  %v1678_v38 = vmul.f32 %v1674_v6, %v2904_v60  ;;  %v1763_v28 = vsel %vm1282_vm9, %v1752_v15, 0.0  ;;  %v1767_v36 = vsel %vm1282_vm9, %v1754_v4, 0.0 }
 0x355   :  { %v1682_v18 = vmul.f32 %v1676_v9, %v2904_v60  ;;  %v1694_v7 = vsel %vm1282_vm9, %v1683_v33, 0.0  ;;  %v1755_v20 = vsel %vm1282_vm9, %v1748_v61, 0.0 }
 0x356   :  { %v1687_v21 = vadd.f32 %v1686_v51, %v1678_v38 }
 0x357   :  { %v1695_v26 = vadd.f32 %v1694_v7, %v1682_v18 }
 0x358   :  { %1619 = vadd.xlane.f32.xlu1 %v1618_v12  ;;  %1623 = vadd.xlane.f32.xlu0 %v1622_v57 }
 0x359   :  { %1627 = vadd.xlane.f32.xlu2 %v1626_v8 }
 0x35a   :  { %v1732_v31 = vpop.permute.xlu2 %1731  ;;  %v1734_v5 = vpop.permute.xlu1 %1733 }
 0x35b   :  { %v1743_v48 = vsel %vm1282_vm9, %v2849_v40, %v1732_v31  ;;  %v1744_v29 = vsel %vm1282_vm9, %v2882_v23, %v1734_v5  ;;  %v1684_v40 = vmul.f32 %v1677_v34, %v2904_v60  ;;  %v1736_v39 = vpop.permute.xlu0 %1735 }
 0x35c   :  { %v1747_v35 = vmul.f32 %v1743_v48, %v2904_v60  ;;  %v1749_v23 = vmul.f32 %v1744_v29, %v2904_v60  ;;  %v1745_v52 = vsel %vm1282_vm9, %v2856_v43, %v1736_v39 }
 0x35d   :  { %v1699_v49 = vadd.f32 %v1698_v1, %v1684_v40  ;;  %v1751_v62 = vmul.f32 %v1745_v52, %v2904_v60 }
 0x35e   :  { %v1756_v44 = vadd.f32 %v1755_v20, %v1747_v35  ;;  %v1760_v45 = vadd.f32 %v1759_v42, %v1749_v23 }
 0x35f   :  { %v1764_v43 = vadd.f32 %v1763_v28, %v1751_v62 }
 0x360   :  { %1688 = vadd.xlane.f32.xlu1 %v1687_v21  ;;  %1692 = vadd.xlane.f32.xlu0 %v1691_v22 }
 0x361   :  { %1696 = vadd.xlane.f32.xlu2 %v1695_v26 }
 0x362   :  { %v1738_v19 = vpop.permute.xlu2 %1737 }
 0x363   :  { %v1746_v53 = vsel %vm1282_vm9, %v2887_v59, %v1738_v19  ;;  %v3000_v59 = vld [vmem:[#allocation2] ss:$0 sm:$0xff]  ;;  %vm1726_vm9 = vcmask 23568  }
 0x364   :  { %v1753_v13 = vmul.f32 %v1746_v53, %v2904_v60 }
 0x366   :  { %v1768_v16 = vadd.f32 %v1767_v36, %v1753_v13 }
 0x368   :  { %1700 = vadd.xlane.f32.xlu1 %v1699_v49  ;;  %1757 = vadd.xlane.f32.xlu0 %v1756_v44 }
 0x369   :  { %1761 = vadd.xlane.f32.xlu2 %v1760_v45 }
 0x370   :  { %1765 = vadd.xlane.f32.xlu1 %v1764_v43  ;;  %1769 = vadd.xlane.f32.xlu0 %v1768_v16 }
 0x3bb   :  { %v1564_v24 = vpop.xlane.xlu0 %1563 }
 0x3bc   :  { %v1556_v56 = vpop.xlane.xlu2 %1555  ;;  %v1574_v58 = vadd.f32 %v3000_v59, %v1564_v24 }
 0x3bd   :  { %v1572_v63 = vadd.f32 %v3000_v59, %v1556_v56 }
 0x3be   :  { %1851 = vtanh.f32 %v1574_v58 }
 0x3bf   :  { %1853 = vtanh.f32 %v1572_v63 }
 0x3c3   :  { %v1568_v60 = vpop.xlane.xlu1 %1567  ;;  %v1616_v0 = vpop.xlane.xlu0 %1615 }
 0x3c4   :  { %v1852_v54 = vpop.eup %1851  ;;  %v1575_v12 = vadd.f32 %v3000_v59, %v1568_v60  ;;  %v1560_v2 = vpop.xlane.xlu2 %1559  ;;  %v1629_v57 = vadd.f32 %v3000_v59, %v1616_v0 }
 0x3c5   :  { %v1854_v3 = vpop.eup %1853  ;;  %v1573_v6 = vadd.f32 %v3000_v59, %v1560_v2  ;;  %1583 = vst.msk [vmem:[%s3087_s17 + $0x10] sm:$0xff] %vm1580_vm1, %v1852_v54 }
 0x3c6   :  { %1855 = vtanh.f32 %v1575_v12  ;;  %1581 = vst.msk [vmem:[%s3087_s17] sm:$0xff] %vm1580_vm1, %v1854_v3 }
 0x3c7   :  { %1857 = vtanh.f32 %v1573_v6 }
 0x3c8   :  { %1859 = vtanh.f32 %v1629_v57 }
 0x3cb   :  { %v1620_v8 = vpop.xlane.xlu1 %1619  ;;  %v1624_v9 = vpop.xlane.xlu0 %1623 }
 0x3cc   :  { %v1856_v10 = vpop.eup %1855  ;;  %v1630_v11 = vadd.f32 %v3000_v59, %v1620_v8  ;;  %v1628_v14 = vpop.xlane.xlu2 %1627  ;;  %v1631_v55 = vadd.f32 %v3000_v59, %v1624_v9 }
 0x3cd   :  { %v1858_v33 = vpop.eup %1857  ;;  %v1632_v17 = vadd.f32 %v3000_v59, %v1628_v14  ;;  %1584 = vst.msk [vmem:[%s3087_s17 + $0x18] sm:$0xff] %vm1580_vm1, %v1856_v10 }
 0x3ce   :  { %v1860_v38 = vpop.eup %1859  ;;  %1861 = vtanh.f32 %v1630_v11  ;;  %1582 = vst.msk [vmem:[%s3087_s17 + $0x8] sm:$0xff] %vm1580_vm1, %v1858_v33 }
 0x3cf   :  { %1863 = vtanh.f32 %v1632_v17  ;;  %1641 = vrot.lane.b32.xlu2 %v1860_v38, %s1940_s0 }
 0x3d0   :  { %1865 = vtanh.f32 %v1631_v55 }
 0x3d3   :  { %v1689_v31 = vpop.xlane.xlu1 %1688  ;;  %v1693_v18 = vpop.xlane.xlu0 %1692 }
 0x3d4   :  { %v1862_v5 = vpop.eup %1861  ;;  %v1702_v51 = vadd.f32 %v3000_v59, %v1689_v31  ;;  %v1697_v37 = vpop.xlane.xlu2 %1696  ;;  %v1703_v21 = vadd.f32 %v3000_v59, %v1693_v18 }
 0x3d5   :  { %v1864_v7 = vpop.eup %1863  ;;  %v1704_v22 = vadd.f32 %v3000_v59, %v1697_v37  ;;  %1643 = vrot.lane.b32.xlu1 %v1862_v5, %s1940_s0 }
 0x3d6   :  { %v1866_v25 = vpop.eup %1865  ;;  %1867 = vtanh.f32 %v1702_v51 }
 0x3d7   :  { %1869 = vtanh.f32 %v1704_v22  ;;  %1647 = vrot.lane.b32.xlu2 %v1864_v7, %s1940_s0  ;;  %1645 = vrot.lane.b32.xlu0 %v1866_v25, %s1940_s0 }
 0x3d8   :  { %1871 = vtanh.f32 %v1703_v21 }
 0x3db   :  { %v1701_v34 = vpop.xlane.xlu1 %1700  ;;  %v1758_v48 = vpop.xlane.xlu0 %1757 }
 0x3dc   :  { %v1868_v26 = vpop.eup %1867  ;;  %v1705_v27 = vadd.f32 %v3000_v59, %v1701_v34  ;;  %v1762_v29 = vpop.xlane.xlu2 %1761  ;;  %v1771_v46 = vadd.f32 %v3000_v59, %v1758_v48 }
 0x3dd   :  { %v1870_v30 = vpop.eup %1869  ;;  %v1772_v32 = vadd.f32 %v3000_v59, %v1762_v29 }
 0x3de   :  { %v1872_v61 = vpop.eup %1871  ;;  %1873 = vtanh.f32 %v1705_v27 }
 0x3df   :  { %1875 = vtanh.f32 %v1772_v32  ;;  %1718 = vrot.lane.b32.xlu2 %v1870_v30, %s1941_s30  ;;  %1716 = vrot.lane.b32.xlu1 %v1872_v61, %s1941_s30 }
 0x3e0   :  { %1877 = vtanh.f32 %v1771_v46  ;;  %1714 = vrot.lane.b32.xlu0 %v1868_v26, %s1941_s30 }
 0x3e3   :  { %v1766_v40 = vpop.xlane.xlu1 %1765  ;;  %v1770_v35 = vpop.xlane.xlu0 %1769 }
 0x3e4   :  { %v1874_v50 = vpop.eup %1873  ;;  %v1773_v23 = vadd.f32 %v3000_v59, %v1766_v40  ;;  %v1774_v39 = vadd.f32 %v3000_v59, %v1770_v35 }
 0x3e5   :  { %v1876_v19 = vpop.eup %1875 }
 0x3e6   :  { %v1878_v1 = vpop.eup %1877  ;;  %1879 = vtanh.f32 %v1773_v23 }
 0x3e7   :  { %1881 = vtanh.f32 %v1774_v39  ;;  %1785 = vrot.lane.b32.xlu2 %v1876_v19, %s1942_s18  ;;  %1783 = vrot.lane.b32.xlu1 %v1878_v1, %s1942_s18 }
 0x3e8   :  { %1720 = vrot.lane.b32.xlu0 %v1874_v50, %s1941_s30 }
 0x3ec   :  { %v1880_v20 = vpop.eup %1879 }
 0x3ed   :  { %v1882_v41 = vpop.eup %1881 }
 0x3ef   :  { %1789 = vrot.lane.b32.xlu1 %v1882_v41, %s1942_s18 }
 0x3f0   :  { %1787 = vrot.lane.b32.xlu0 %v1880_v20, %s1942_s18 }
 0x429   :  { %v1642_v49 = vpop.permute.xlu2 %1641 }
 0x42a   :  { %1654 = vst.msk [vmem:[%s3087_s17] sm:$0xff] %vm1653_vm7, %v1642_v49 }
 0x431   :  { %v1648_v42 = vpop.permute.xlu2 %1647 }
 0x432   :  { %1657 = vst.msk [vmem:[%s3087_s17 + $0x18] sm:$0xff] %vm1653_vm7, %v1648_v42 }
 0x439   :  { %v1719_v47 = vpop.permute.xlu2 %1718 }
 0x441   :  { %v1786_v45 = vpop.permute.xlu2 %1785 }
 0x447   :  { %v1644_v44 = vpop.permute.xlu1 %1643 }
 0x448   :  { %1655 = vst.msk [vmem:[%s3087_s17 + $0x8] sm:$0xff] %vm1653_vm7, %v1644_v44 }
 0x449   :  { %v1646_v52 = vpop.permute.xlu0 %1645 }
 0x44a   :  { %1656 = vst.msk [vmem:[%s3087_s17 + $0x10] sm:$0xff] %vm1653_vm7, %v1646_v52 }
 0x44b   :  { %1729 = vst.msk [vmem:[%s3087_s17 + $0x10] sm:$0xff] %vm1726_vm9, %v1719_v47 }
 0x451   :  { %v1717_v53 = vpop.permute.xlu1 %1716 }
 0x452   :  { %1728 = vst.msk [vmem:[%s3087_s17 + $0x8] sm:$0xff] %vm1726_vm9, %v1717_v53  ;;  %v1715_v15 = vpop.permute.xlu0 %1714 }
 0x453   :  { %1797 = vst.msk [vmem:[%s3087_s17 + $0x8] sm:$0xff] %vm1795_vm0, %v1786_v45 }
 0x454   :  { %1727 = vst.msk [vmem:[%s3087_s17] sm:$0xff] %vm1726_vm9, %v1715_v15 }
 0x459   :  { %v1784_v4 = vpop.permute.xlu1 %1783 }
 0x45a   :  { %1796 = vst.msk [vmem:[%s3087_s17] sm:$0xff] %vm1795_vm0, %v1784_v4  ;;  %v1721_v62 = vpop.permute.xlu0 %1720 }
 0x45b   :  { %1730 = vst.msk [vmem:[%s3087_s17 + $0x18] sm:$0xff] %vm1726_vm9, %v1721_v62 }
 0x461   :  { %v1790_v13 = vpop.permute.xlu1 %1789 }
 0x462   :  { %1799 = vst.msk [vmem:[%s3087_s17 + $0x18] sm:$0xff] %vm1795_vm0, %v1790_v13  ;;  %v1788_v28 = vpop.permute.xlu0 %1787 }
 0x463   :  { %1798 = vst.msk [vmem:[%s3087_s17 + $0x10] sm:$0xff] %vm1795_vm0, %v1788_v28 }
 0x464   :  { %1804 = vsyncpa [#allocation4], 1 }
 0x465   :  { %1805 = vsyncpa [#allocation6], 1 }

</bundles_post_ra>
